<compile_context>
chip_gen: v6e
topology: v6e:2x2x1
jax: 0.10.0
libtpu: 0.0.40
codegen_flags: <defaults>
</compile_context>

<pallas_src>
import jax
import jax.numpy as jnp
from jax.experimental import pallas as pl
from jax.experimental.pallas import tpu as pltpu


# ------------------------------- helpers ---------------------------------------


def _round_up(x, m):
    return (x + m - 1) // m * m


def _vmem_limit_bytes():
    """Per-generation VMEM budget (v7x: 64 MiB physical, v5e/v6e: 128 MiB)."""
    cap = 64 * 1024 * 1024
    try:
        cap = int(getattr(pltpu.get_tpu_info(), "vmem_capacity_bytes", cap))
    except Exception:
        pass
    return int(min(cap * 3 // 4, 96 * 1024 * 1024))


def _pick_time_chunk(seq_len, bt, hp, vmem_limit, cap=64):
    """Largest time chunk (divisor of seq_len, <= cap) whose double-buffered streams fit."""
    per_t = bt * (3 * hp + hp) * 4 * 2                       # gi(f32,3Hp) in + out(f32,Hp), x2 buffers
    fixed = hp * 3 * hp * 2 + 4 * hp * 4 + 4 * bt * hp * 4   # bf16 weights, biases, h scratch/work
    budget = max((vmem_limit - fixed) // 2, per_t)           # keep ~50% headroom
    tc = int(max(1, min(seq_len, cap, budget // per_t)))
    while seq_len % tc != 0:                                 # exact-divisor chunking
        tc -= 1
    return tc


def _invariant_spec(block_shape):
    """BlockSpec for a grid-invariant (constant index_map) operand, single-buffered."""
    index_map = lambda b, c: (0,) * len(block_shape)
    try:
        return pl.BlockSpec(block_shape, index_map, pipeline_mode=pl.Buffered(1))
    except (TypeError, AttributeError):      # older Pallas without pipeline_mode/Buffered
        return pl.BlockSpec(block_shape, index_map)


# ------------------------------- Pallas kernel ---------------------------------


def _gru_recurrence_kernel(gi_ref, w_hh_ref, b_hn_ref, out_ref, h_last_ref, h_ref):
    """Sequential GRU recurrence over one (batch block, time chunk).

    Grid = (batch_blocks [parallel], time_chunks [arbitrary, innermost]).

    gi_ref     : (T_chunk, Bt, 3*Hp) f32  pre-computed input projections [r | z | n]
                 (b_ih+b_hh folded for r/z, only b_ih for n)
    w_hh_ref   : (Hp, 3*Hp) bf16          fused recurrent weights [Wr | Wz | Wn]
    b_hn_ref   : (1, Hp) f32              recurrent bias of the "new" gate (scaled by r)
    out_ref    : (T_chunk, Bt, Hp) f32    hidden states for this chunk
    h_last_ref : (Bt, Hp) f32             final hidden state (written on the last chunk)
    h_ref      : (Bt, Hp) f32 VMEM scratch hidden state carried across time chunks
    """
    c = pl.program_id(1)

    @pl.when(c == 0)
    def _init():
        h_ref[...] = jnp.zeros_like(h_ref)

    hdim = h_ref.shape[-1]
    t_chunk = gi_ref.shape[0]

    # Grid-invariant loads hoisted out of the unrolled time loop.
    w = w_hh_ref[...]            # (Hp, 3Hp) bf16
    b_hn = b_hn_ref[...]         # (1, Hp)   f32

    h = h_ref[...]               # (Bt, Hp)  f32
    # Fully unrolled chunk loop (static trip count) -> static-index loads/stores.
    for i in range(t_chunk):
        # One fused MXU push per timestep; f32 accumulation.
        gh = jnp.dot(h.astype(jnp.bfloat16), w, preferred_element_type=jnp.float32)
        gi = gi_ref[i]           # (Bt, 3Hp) f32
        # Lane-aligned static slices (hdim is a multiple of 128).
        r = jax.nn.sigmoid(gi[:, :hdim] + gh[:, :hdim])
        z = jax.nn.sigmoid(gi[:, hdim:2 * hdim] + gh[:, hdim:2 * hdim])
        n = jnp.tanh(gi[:, 2 * hdim:] + r * (gh[:, 2 * hdim:] + b_hn))
        h = (1.0 - z) * n + z * h
        out_ref[i] = h.astype(out_ref.dtype)

    h_ref[...] = h

    @pl.when(c == pl.num_programs(1) - 1)
    def _finalize():
        h_last_ref[...] = h.astype(h_last_ref.dtype)


# ------------------------------- layer wrapper ---------------------------------


def gru_layer_forward(x, p, *, batch_first=False, t_chunk_cap=64):
    """One GRU layer.

    x: (S, B, Din) if batch_first=False, else (B, S, Din).  B must be a multiple of 8
       (padded by the caller).  Din is either the embedding size (layer 0) or the padded
       hidden size of the previous layer.
    Returns (out (S, B, Hp), h_last (B, Hp)) with Hp = round_up(H, 128); padded hidden
    lanes are exactly zero.
    """
    H = p["w_hh_r"].shape[0]
    Hp = _round_up(H, 128)
    din_x = x.shape[-1]

    def pad_ih(w):   # (Din_param, H) -> (din_x, Hp), zero-padded
        return jnp.pad(w, ((0, din_x - w.shape[0]), (0, Hp - H)))

    def pad_hh(w):   # (H, H) -> (Hp, Hp)
        return jnp.pad(w, ((0, Hp - H), (0, Hp - H)))

    def pad_b(b):    # (1, H) -> (1, Hp)
        return jnp.pad(b, ((0, 0), (0, Hp - H)))

    # Fused, padded weights/biases (gate order [r, z, n]).
    w_ih = jnp.concatenate([pad_ih(p["w_ih_r"]), pad_ih(p["w_ih_z"]), pad_ih(p["w_ih_n"])], axis=1)
    b_i = jnp.concatenate([pad_b(p["b_r"]), pad_b(p["b_z"]), pad_b(p["b_in"])], axis=1)
    w_hh = jnp.concatenate([pad_hh(p["w_hh_r"]), pad_hh(p["w_hh_z"]), pad_hh(p["w_hh_n"])],
                           axis=1).astype(jnp.bfloat16)                       # (Hp, 3Hp) bf16
    b_hn = pad_b(p["b_hn"])                                                    # (1, Hp)

    # Hoisted input projection: one big matmul over ALL timesteps (folds layer-0 permute).
    eq = "bsd,dh->sbh" if batch_first else "sbd,dh->sbh"
    gi = jnp.einsum(eq, x, w_ih) + b_i                                         # (S, Bp, 3Hp) f32

    S, Bp, _ = gi.shape
    # Parallel batch axis: >1 block only when it stays (8,128)-aligned (v7x 2nd TC).
    nb = 2 if Bp % 16 == 0 else 1
    Bt = Bp // nb

    vmem_limit = _vmem_limit_bytes()
    tc = _pick_time_chunk(S, Bt, Hp, vmem_limit, cap=t_chunk_cap)
    nc = S // tc

    out, h_last = pl.pallas_call(
        _gru_recurrence_kernel,
        out_shape=(
            jax.ShapeDtypeStruct((S, Bp, Hp), jnp.float32),
            jax.ShapeDtypeStruct((Bp, Hp), jnp.float32),
        ),
        grid_spec=pltpu.PrefetchScalarGridSpec(
            num_scalar_prefetch=0,
            grid=(nb, nc),
            in_specs=[
                pl.BlockSpec((tc, Bt, 3 * Hp), lambda b, c: (c, b, 0)),
                _invariant_spec((Hp, 3 * Hp)),
                _invariant_spec((1, Hp)),
            ],
            out_specs=[
                pl.BlockSpec((tc, Bt, Hp), lambda b, c: (c, b, 0)),
                pl.BlockSpec((Bt, Hp), lambda b, c: (b, 0)),
            ],
            scratch_shapes=[pltpu.VMEM((Bt, Hp), jnp.float32)],
        ),
        compiler_params=pltpu.CompilerParams(
            # batch blocks independent; time chunks strictly sequential (innermost).
            dimension_semantics=("parallel", "arbitrary"),
            vmem_limit_bytes=vmem_limit,
        ),
    )(gi, w_hh, b_hn)
    return out, h_last


# ------------------------------- params & forward ------------------------------


def init_params(key, vocab_size, embedding_size, hidden_size, hidden_layers):
    """Deterministic parameter init (shapes/semantics match nn.Embedding + nn.GRU).

    Weights stored pre-transposed and per-gate; reset/update biases pre-folded.
    """
    params = {}
    key, k_emb = jax.random.split(key)
    params["embedding"] = jax.random.normal(
        k_emb, (vocab_size, embedding_size), dtype=jnp.float32)

    bound = 1.0 / float(hidden_size) ** 0.5

    def u(k, shape):
        return jax.random.uniform(k, shape, minval=-bound, maxval=bound, dtype=jnp.float32)

    layers = []
    for layer in range(hidden_layers):
        din = embedding_size if layer == 0 else hidden_size
        key, *ks = jax.random.split(key, 11)
        layers.append(dict(
            w_ih_r=u(ks[0], (din, hidden_size)),
            w_ih_z=u(ks[1], (din, hidden_size)),
            w_ih_n=u(ks[2], (din, hidden_size)),
            w_hh_r=u(ks[3], (hidden_size, hidden_size)),
            w_hh_z=u(ks[4], (hidden_size, hidden_size)),
            w_hh_n=u(ks[5], (hidden_size, hidden_size)),
            b_r=u(ks[6], (1, hidden_size)),    # folded b_ih_r + b_hh_r
            b_z=u(ks[7], (1, hidden_size)),    # folded b_ih_z + b_hh_z
            b_in=u(ks[8], (1, hidden_size)),   # b_ih_n
            b_hn=u(ks[9], (1, hidden_size)),   # b_hh_n (scaled by r -> kept separate)
        ))
    params["gru"] = layers
    return params


@jax.jit
def seq2seq_enco_forward(params, tokens):
    """tokens: (batch, seq) int32 -> (output (S,B,H), state (L,B,H))."""
    B, S = tokens.shape
    H = params["gru"][0]["w_hh_r"].shape[0]

    # Pad batch to a multiple of 8 (sublane-dense); padded rows discarded at the end.
    Bp = _round_up(B, 8)
    tokens_p = jnp.pad(tokens, ((0, Bp - B), (0, 0)))
    emb = jnp.take(params["embedding"], tokens_p, axis=0)      # (Bp, S, E) gather in plain JAX

    x = emb
    finals = []
    for li, layer in enumerate(params["gru"]):
        x, h_last = gru_layer_forward(x, layer, batch_first=(li == 0))
        finals.append(h_last)
    state = jnp.stack(finals, axis=0)                          # (L, Bp, Hp)
    return x[:, :B, :H], state[:, :B, :H]


# ------------------------------- pure-JAX references ---------------------------


def _gru_layer_ref(x_sbd, p, *, bf16_matmul=False):
    H = p["w_hh_r"].shape[0]

    def mm(a, w):
        if bf16_matmul:   # mirror the kernel: bf16 MXU operands, f32 accumulation
            return jnp.dot(a.astype(jnp.bfloat16), w.astype(jnp.bfloat16),
                           preferred_element_type=jnp.float32)
        return jnp.dot(a, w)

    def step(h, x_t):
        r = jax.nn.sigmoid(x_t @ p["w_ih_r"] + p["b_r"] + mm(h, p["w_hh_r"]))
        z = jax.nn.sigmoid(x_t @ p["w_ih_z"] + p["b_z"] + mm(h, p["w_hh_z"]))
        n = jnp.tanh(x_t @ p["w_ih_n"] + p["b_in"] + r * (mm(h, p["w_hh_n"]) + p["b_hn"]))
        h_new = (1.0 - z) * n + z * h
        return h_new, h_new

    h0 = jnp.zeros((x_sbd.shape[1], H), jnp.float32)
    h_T, out = jax.lax.scan(step, h0, x_sbd)
    return out, h_T


def seq2seq_enco_ref(params, tokens, *, bf16_matmul=False):
    emb = jnp.take(params["embedding"], tokens, axis=0)        # (B, S, E)
    x = jnp.transpose(emb, (1, 0, 2))                          # (S, B, E)
    finals = []
    for p in params["gru"]:
        x, h_T = _gru_layer_ref(x, p, bf16_matmul=bf16_matmul)
        finals.append(h_T)
    return x, jnp.stack(finals, axis=0)


# ------------------------------- test harness ----------------------------------


if __name__ == "__main__":
    vocab_size = 20
    embedding_size = 16
    hidden_size = 32
    hidden_layers = 2
    batch = 4
    seq = 8

    key = jax.random.PRNGKey(0)
    key, k_tok = jax.random.split(key)
    tokens = jax.random.randint(k_tok, (batch, seq), 0, vocab_size, dtype=jnp.int32)

    params = init_params(key, vocab_size, embedding_size, hidden_size, hidden_layers)

    out, state = seq2seq_enco_forward(params, tokens)
    out = jax.block_until_ready(out)
    state = jax.block_until_ready(state)

    assert out.shape == (seq, batch, hidden_size)
    assert state.shape == (hidden_layers, batch, hidden_size)

    # Tight check against a pure-JAX reference of the SAME math (bf16 MXU operands).
    out_m, state_m = seq2seq_enco_ref(params, tokens, bf16_matmul=True)
    assert jnp.allclose(out, out_m, atol=2e-3, rtol=2e-3), float(jnp.max(jnp.abs(out - out_m)))
    assert jnp.allclose(state, state_m, atol=2e-3, rtol=2e-3), float(jnp.max(jnp.abs(state - state_m)))

    # Loose sanity check against the full-f32 PyTorch-semantics reference
    # (bf16 recurrent matmuls accumulate small rounding over the sequence).
    out_f, state_f = seq2seq_enco_ref(params, tokens, bf16_matmul=False)
    assert jnp.allclose(out, out_f, atol=1e-1), float(jnp.max(jnp.abs(out - out_f)))
    assert jnp.allclose(state, state_f, atol=1e-1), float(jnp.max(jnp.abs(state - state_f)))

    print("KERNEL_OK")
</pallas_src>

<mosaic_0001>
module attributes {stable_mosaic.version = 11 : i64} {
  func.func @_gru_recurrence_kernel(%arg0: i32, %arg1: i32, %arg2: memref<8x8x384xf32, #tpu.memory_space<vmem>>, %arg3: memref<128x384xbf16, #tpu.memory_space<vmem>>, %arg4: memref<1x128xf32, #tpu.memory_space<vmem>>, %arg5: memref<8x8x128xf32, #tpu.memory_space<vmem>>, %arg6: memref<8x128xf32, #tpu.memory_space<vmem>>, %arg7: memref<8x128xf32, #tpu.memory_space<vmem>>) attributes {dimension_semantics = [#tpu.dimension_semantics<parallel>, #tpu.dimension_semantics<arbitrary>], iteration_bounds = array<i64: 1, 1>, scalar_prefetch = 0 : i64, scratch_operands = 1 : i64, tpu.core_type = #tpu.core_type<tc>, window_params = [{transform_indices = @transform_0, window_bounds = array<i64: 8, 8, 384>}, {pipeline_mode = #tpu.pipeline_mode<synchronous>, transform_indices = @transform_1, window_bounds = array<i64: 128, 384>}, {pipeline_mode = #tpu.pipeline_mode<synchronous>, transform_indices = @transform_2, window_bounds = array<i64: 1, 128>}, {transform_indices = @transform_3, window_bounds = array<i64: 8, 8, 128>}, {transform_indices = @transform_4, window_bounds = array<i64: 8, 128>}]} {
    %c0_i32 = arith.constant 0 : i32
    %0 = arith.cmpi eq, %arg1, %c0_i32 : i32
    %1 = arith.extui %0 : i1 to i32
    %c0_i32_0 = arith.constant 0 : i32
    %2 = arith.cmpi ne, %1, %c0_i32_0 : i32
    scf.if %2 {
      %cst_82 = arith.constant 0.000000e+00 : f32
      %290 = vector.broadcast %cst_82 : f32 to vector<8x128xf32>
      %c0_83 = arith.constant 0 : index
      %c0_84 = arith.constant 0 : index
      %291 = vector.load %arg7[%c0_83, %c0_84] : memref<8x128xf32, #tpu.memory_space<vmem>>, vector<8x128xf32>
      tpu.vector_store %arg7[%c0_83, %c0_84], %290 {strides = array<i32>} : memref<8x128xf32, #tpu.memory_space<vmem>>, vector<8x128xf32>,
    } else {
    }
    %c0 = arith.constant 0 : index
    %c0_1 = arith.constant 0 : index
    %3 = vector.load %arg3[%c0, %c0_1] : memref<128x384xbf16, #tpu.memory_space<vmem>>, vector<128x384xbf16>
    %c0_2 = arith.constant 0 : index
    %c0_3 = arith.constant 0 : index
    %4 = vector.load %arg4[%c0_2, %c0_3] : memref<1x128xf32, #tpu.memory_space<vmem>>, vector<1x128xf32>
    %c0_4 = arith.constant 0 : index
    %c0_5 = arith.constant 0 : index
    %5 = vector.load %arg7[%c0_4, %c0_5] : memref<8x128xf32, #tpu.memory_space<vmem>>, vector<8x128xf32>
    %6 = arith.truncf %5 : vector<8x128xf32> to vector<8x128xbf16>
    %cst = arith.constant dense<0.000000e+00> : vector<8x384xf32>
    %7 = tpu.matmul %6, %3, %cst {dimension_numbers = #tpu.dot_dimension_numbers<[1], [0], [0], [1], [0, 0, 1, 1], [], []>} : vector<8x128xbf16>, vector<128x384xbf16>, vector<8x384xf32> -> vector<8x384xf32>
    %c0_6 = arith.constant 0 : index
    %c0_7 = arith.constant 0 : index
    %c0_8 = arith.constant 0 : index
    %8 = vector.load %arg2[%c0_6, %c0_7, %c0_8] : memref<8x8x384xf32, #tpu.memory_space<vmem>>, vector<1x8x384xf32>
    %9 = vector.shape_cast %8 : vector<1x8x384xf32> to vector<8x384xf32>
    %10 = vector.extract_strided_slice %9 {offsets = [0, 0], sizes = [8, 128], strides = [1, 1]} : vector<8x384xf32> to vector<8x128xf32>
    %11 = vector.extract_strided_slice %7 {offsets = [0, 0], sizes = [8, 128], strides = [1, 1]} : vector<8x384xf32> to vector<8x128xf32>
    %12 = arith.addf %10, %11 : vector<8x128xf32>
    %13 = arith.negf %12 : vector<8x128xf32>
    %14 = math.exp %13 : vector<8x128xf32>
    %cst_9 = arith.constant 1.000000e+00 : f32
    %15 = vector.broadcast %cst_9 : f32 to vector<8x128xf32>
    %16 = arith.addf %15, %14 : vector<8x128xf32>
    %17 = arith.divf %15, %16 : vector<8x128xf32>
    %18 = vector.extract_strided_slice %9 {offsets = [0, 128], sizes = [8, 128], strides = [1, 1]} : vector<8x384xf32> to vector<8x128xf32>
    %19 = vector.extract_strided_slice %7 {offsets = [0, 128], sizes = [8, 128], strides = [1, 1]} : vector<8x384xf32> to vector<8x128xf32>
    %20 = arith.addf %18, %19 : vector<8x128xf32>
    %21 = arith.negf %20 : vector<8x128xf32>
    %22 = math.exp %21 : vector<8x128xf32>
    %cst_10 = arith.constant 1.000000e+00 : f32
    %23 = vector.broadcast %cst_10 : f32 to vector<8x128xf32>
    %24 = arith.addf %23, %22 : vector<8x128xf32>
    %25 = arith.divf %23, %24 : vector<8x128xf32>
    %26 = vector.extract_strided_slice %9 {offsets = [0, 256], sizes = [8, 128], strides = [1, 1]} : vector<8x384xf32> to vector<8x128xf32>
    %27 = vector.extract_strided_slice %7 {offsets = [0, 256], sizes = [8, 128], strides = [1, 1]} : vector<8x384xf32> to vector<8x128xf32>
    %28 = vector.broadcast %4 : vector<1x128xf32> to vector<8x128xf32>
    %29 = arith.addf %27, %28 : vector<8x128xf32>
    %30 = arith.mulf %17, %29 : vector<8x128xf32>
    %31 = arith.addf %26, %30 : vector<8x128xf32>
    %32 = math.tanh %31 : vector<8x128xf32>
    %cst_11 = arith.constant 1.000000e+00 : f32
    %33 = vector.broadcast %cst_11 : f32 to vector<8x128xf32>
    %34 = arith.subf %33, %25 : vector<8x128xf32>
    %35 = arith.mulf %34, %32 : vector<8x128xf32>
    %36 = arith.mulf %25, %5 : vector<8x128xf32>
    %37 = arith.addf %35, %36 : vector<8x128xf32>
    %c0_12 = arith.constant 0 : index
    %c0_13 = arith.constant 0 : index
    %c0_14 = arith.constant 0 : index
    %38 = vector.load %arg5[%c0_12, %c0_13, %c0_14] : memref<8x8x128xf32, #tpu.memory_space<vmem>>, vector<1x8x128xf32>
    %39 = vector.shape_cast %38 : vector<1x8x128xf32> to vector<8x128xf32>
    %40 = vector.shape_cast %37 : vector<8x128xf32> to vector<1x8x128xf32>
    tpu.vector_store %arg5[%c0_12, %c0_13, %c0_14], %40 {strides = array<i32>} : memref<8x8x128xf32, #tpu.memory_space<vmem>>, vector<1x8x128xf32>,
    %41 = arith.truncf %37 : vector<8x128xf32> to vector<8x128xbf16>
    %cst_15 = arith.constant dense<0.000000e+00> : vector<8x384xf32>
    %42 = tpu.matmul %41, %3, %cst_15 {dimension_numbers = #tpu.dot_dimension_numbers<[1], [0], [0], [1], [0, 0, 1, 1], [], []>} : vector<8x128xbf16>, vector<128x384xbf16>, vector<8x384xf32> -> vector<8x384xf32>
    %c1 = arith.constant 1 : index
    %c0_16 = arith.constant 0 : index
    %c0_17 = arith.constant 0 : index
    %43 = vector.load %arg2[%c1, %c0_16, %c0_17] : memref<8x8x384xf32, #tpu.memory_space<vmem>>, vector<1x8x384xf32>
    %44 = vector.shape_cast %43 : vector<1x8x384xf32> to vector<8x384xf32>
    %45 = vector.extract_strided_slice %44 {offsets = [0, 0], sizes = [8, 128], strides = [1, 1]} : vector<8x384xf32> to vector<8x128xf32>
    %46 = vector.extract_strided_slice %42 {offsets = [0, 0], sizes = [8, 128], strides = [1, 1]} : vector<8x384xf32> to vector<8x128xf32>
    %47 = arith.addf %45, %46 : vector<8x128xf32>
    %48 = arith.negf %47 : vector<8x128xf32>
    %49 = math.exp %48 : vector<8x128xf32>
    %cst_18 = arith.constant 1.000000e+00 : f32
    %50 = vector.broadcast %cst_18 : f32 to vector<8x128xf32>
    %51 = arith.addf %50, %49 : vector<8x128xf32>
    %52 = arith.divf %50, %51 : vector<8x128xf32>
    %53 = vector.extract_strided_slice %44 {offsets = [0, 128], sizes = [8, 128], strides = [1, 1]} : vector<8x384xf32> to vector<8x128xf32>
    %54 = vector.extract_strided_slice %42 {offsets = [0, 128], sizes = [8, 128], strides = [1, 1]} : vector<8x384xf32> to vector<8x128xf32>
    %55 = arith.addf %53, %54 : vector<8x128xf32>
    %56 = arith.negf %55 : vector<8x128xf32>
    %57 = math.exp %56 : vector<8x128xf32>
    %cst_19 = arith.constant 1.000000e+00 : f32
    %58 = vector.broadcast %cst_19 : f32 to vector<8x128xf32>
    %59 = arith.addf %58, %57 : vector<8x128xf32>
    %60 = arith.divf %58, %59 : vector<8x128xf32>
    %61 = vector.extract_strided_slice %44 {offsets = [0, 256], sizes = [8, 128], strides = [1, 1]} : vector<8x384xf32> to vector<8x128xf32>
    %62 = vector.extract_strided_slice %42 {offsets = [0, 256], sizes = [8, 128], strides = [1, 1]} : vector<8x384xf32> to vector<8x128xf32>
    %63 = vector.broadcast %4 : vector<1x128xf32> to vector<8x128xf32>
    %64 = arith.addf %62, %63 : vector<8x128xf32>
    %65 = arith.mulf %52, %64 : vector<8x128xf32>
    %66 = arith.addf %61, %65 : vector<8x128xf32>
    %67 = math.tanh %66 : vector<8x128xf32>
    %cst_20 = arith.constant 1.000000e+00 : f32
    %68 = vector.broadcast %cst_20 : f32 to vector<8x128xf32>
    %69 = arith.subf %68, %60 : vector<8x128xf32>
    %70 = arith.mulf %69, %67 : vector<8x128xf32>
    %71 = arith.mulf %60, %37 : vector<8x128xf32>
    %72 = arith.addf %70, %71 : vector<8x128xf32>
    %c1_21 = arith.constant 1 : index
    %c0_22 = arith.constant 0 : index
    %c0_23 = arith.constant 0 : index
    %73 = vector.load %arg5[%c1_21, %c0_22, %c0_23] : memref<8x8x128xf32, #tpu.memory_space<vmem>>, vector<1x8x128xf32>
    %74 = vector.shape_cast %73 : vector<1x8x128xf32> to vector<8x128xf32>
    %75 = vector.shape_cast %72 : vector<8x128xf32> to vector<1x8x128xf32>
    tpu.vector_store %arg5[%c1_21, %c0_22, %c0_23], %75 {strides = array<i32>} : memref<8x8x128xf32, #tpu.memory_space<vmem>>, vector<1x8x128xf32>,
    %76 = arith.truncf %72 : vector<8x128xf32> to vector<8x128xbf16>
    %cst_24 = arith.constant dense<0.000000e+00> : vector<8x384xf32>
    %77 = tpu.matmul %76, %3, %cst_24 {dimension_numbers = #tpu.dot_dimension_numbers<[1], [0], [0], [1], [0, 0, 1, 1], [], []>} : vector<8x128xbf16>, vector<128x384xbf16>, vector<8x384xf32> -> vector<8x384xf32>
    %c2 = arith.constant 2 : index
    %c0_25 = arith.constant 0 : index
    %c0_26 = arith.constant 0 : index
    %78 = vector.load %arg2[%c2, %c0_25, %c0_26] : memref<8x8x384xf32, #tpu.memory_space<vmem>>, vector<1x8x384xf32>
    %79 = vector.shape_cast %78 : vector<1x8x384xf32> to vector<8x384xf32>
    %80 = vector.extract_strided_slice %79 {offsets = [0, 0], sizes = [8, 128], strides = [1, 1]} : vector<8x384xf32> to vector<8x128xf32>
    %81 = vector.extract_strided_slice %77 {offsets = [0, 0], sizes = [8, 128], strides = [1, 1]} : vector<8x384xf32> to vector<8x128xf32>
    %82 = arith.addf %80, %81 : vector<8x128xf32>
    %83 = arith.negf %82 : vector<8x128xf32>
    %84 = math.exp %83 : vector<8x128xf32>
    %cst_27 = arith.constant 1.000000e+00 : f32
    %85 = vector.broadcast %cst_27 : f32 to vector<8x128xf32>
    %86 = arith.addf %85, %84 : vector<8x128xf32>
    %87 = arith.divf %85, %86 : vector<8x128xf32>
    %88 = vector.extract_strided_slice %79 {offsets = [0, 128], sizes = [8, 128], strides = [1, 1]} : vector<8x384xf32> to vector<8x128xf32>
    %89 = vector.extract_strided_slice %77 {offsets = [0, 128], sizes = [8, 128], strides = [1, 1]} : vector<8x384xf32> to vector<8x128xf32>
    %90 = arith.addf %88, %89 : vector<8x128xf32>
    %91 = arith.negf %90 : vector<8x128xf32>
    %92 = math.exp %91 : vector<8x128xf32>
    %cst_28 = arith.constant 1.000000e+00 : f32
    %93 = vector.broadcast %cst_28 : f32 to vector<8x128xf32>
    %94 = arith.addf %93, %92 : vector<8x128xf32>
    %95 = arith.divf %93, %94 : vector<8x128xf32>
    %96 = vector.extract_strided_slice %79 {offsets = [0, 256], sizes = [8, 128], strides = [1, 1]} : vector<8x384xf32> to vector<8x128xf32>
    %97 = vector.extract_strided_slice %77 {offsets = [0, 256], sizes = [8, 128], strides = [1, 1]} : vector<8x384xf32> to vector<8x128xf32>
    %98 = vector.broadcast %4 : vector<1x128xf32> to vector<8x128xf32>
    %99 = arith.addf %97, %98 : vector<8x128xf32>
    %100 = arith.mulf %87, %99 : vector<8x128xf32>
    %101 = arith.addf %96, %100 : vector<8x128xf32>
    %102 = math.tanh %101 : vector<8x128xf32>
    %cst_29 = arith.constant 1.000000e+00 : f32
    %103 = vector.broadcast %cst_29 : f32 to vector<8x128xf32>
    %104 = arith.subf %103, %95 : vector<8x128xf32>
    %105 = arith.mulf %104, %102 : vector<8x128xf32>
    %106 = arith.mulf %95, %72 : vector<8x128xf32>
    %107 = arith.addf %105, %106 : vector<8x128xf32>
    %c2_30 = arith.constant 2 : index
    %c0_31 = arith.constant 0 : index
    %c0_32 = arith.constant 0 : index
    %108 = vector.load %arg5[%c2_30, %c0_31, %c0_32] : memref<8x8x128xf32, #tpu.memory_space<vmem>>, vector<1x8x128xf32>
    %109 = vector.shape_cast %108 : vector<1x8x128xf32> to vector<8x128xf32>
    %110 = vector.shape_cast %107 : vector<8x128xf32> to vector<1x8x128xf32>
    tpu.vector_store %arg5[%c2_30, %c0_31, %c0_32], %110 {strides = array<i32>} : memref<8x8x128xf32, #tpu.memory_space<vmem>>, vector<1x8x128xf32>,
    %111 = arith.truncf %107 : vector<8x128xf32> to vector<8x128xbf16>
    %cst_33 = arith.constant dense<0.000000e+00> : vector<8x384xf32>
    %112 = tpu.matmul %111, %3, %cst_33 {dimension_numbers = #tpu.dot_dimension_numbers<[1], [0], [0], [1], [0, 0, 1, 1], [], []>} : vector<8x128xbf16>, vector<128x384xbf16>, vector<8x384xf32> -> vector<8x384xf32>
    %c3 = arith.constant 3 : index
    %c0_34 = arith.constant 0 : index
    %c0_35 = arith.constant 0 : index
    %113 = vector.load %arg2[%c3, %c0_34, %c0_35] : memref<8x8x384xf32, #tpu.memory_space<vmem>>, vector<1x8x384xf32>
    %114 = vector.shape_cast %113 : vector<1x8x384xf32> to vector<8x384xf32>
    %115 = vector.extract_strided_slice %114 {offsets = [0, 0], sizes = [8, 128], strides = [1, 1]} : vector<8x384xf32> to vector<8x128xf32>
    %116 = vector.extract_strided_slice %112 {offsets = [0, 0], sizes = [8, 128], strides = [1, 1]} : vector<8x384xf32> to vector<8x128xf32>
    %117 = arith.addf %115, %116 : vector<8x128xf32>
    %118 = arith.negf %117 : vector<8x128xf32>
    %119 = math.exp %118 : vector<8x128xf32>
    %cst_36 = arith.constant 1.000000e+00 : f32
    %120 = vector.broadcast %cst_36 : f32 to vector<8x128xf32>
    %121 = arith.addf %120, %119 : vector<8x128xf32>
    %122 = arith.divf %120, %121 : vector<8x128xf32>
    %123 = vector.extract_strided_slice %114 {offsets = [0, 128], sizes = [8, 128], strides = [1, 1]} : vector<8x384xf32> to vector<8x128xf32>
    %124 = vector.extract_strided_slice %112 {offsets = [0, 128], sizes = [8, 128], strides = [1, 1]} : vector<8x384xf32> to vector<8x128xf32>
    %125 = arith.addf %123, %124 : vector<8x128xf32>
    %126 = arith.negf %125 : vector<8x128xf32>
    %127 = math.exp %126 : vector<8x128xf32>
    %cst_37 = arith.constant 1.000000e+00 : f32
    %128 = vector.broadcast %cst_37 : f32 to vector<8x128xf32>
    %129 = arith.addf %128, %127 : vector<8x128xf32>
    %130 = arith.divf %128, %129 : vector<8x128xf32>
    %131 = vector.extract_strided_slice %114 {offsets = [0, 256], sizes = [8, 128], strides = [1, 1]} : vector<8x384xf32> to vector<8x128xf32>
    %132 = vector.extract_strided_slice %112 {offsets = [0, 256], sizes = [8, 128], strides = [1, 1]} : vector<8x384xf32> to vector<8x128xf32>
    %133 = vector.broadcast %4 : vector<1x128xf32> to vector<8x128xf32>
    %134 = arith.addf %132, %133 : vector<8x128xf32>
    %135 = arith.mulf %122, %134 : vector<8x128xf32>
    %136 = arith.addf %131, %135 : vector<8x128xf32>
    %137 = math.tanh %136 : vector<8x128xf32>
    %cst_38 = arith.constant 1.000000e+00 : f32
    %138 = vector.broadcast %cst_38 : f32 to vector<8x128xf32>
    %139 = arith.subf %138, %130 : vector<8x128xf32>
    %140 = arith.mulf %139, %137 : vector<8x128xf32>
    %141 = arith.mulf %130, %107 : vector<8x128xf32>
    %142 = arith.addf %140, %141 : vector<8x128xf32>
    %c3_39 = arith.constant 3 : index
    %c0_40 = arith.constant 0 : index
    %c0_41 = arith.constant 0 : index
    %143 = vector.load %arg5[%c3_39, %c0_40, %c0_41] : memref<8x8x128xf32, #tpu.memory_space<vmem>>, vector<1x8x128xf32>
    %144 = vector.shape_cast %143 : vector<1x8x128xf32> to vector<8x128xf32>
    %145 = vector.shape_cast %142 : vector<8x128xf32> to vector<1x8x128xf32>
    tpu.vector_store %arg5[%c3_39, %c0_40, %c0_41], %145 {strides = array<i32>} : memref<8x8x128xf32, #tpu.memory_space<vmem>>, vector<1x8x128xf32>,
    %146 = arith.truncf %142 : vector<8x128xf32> to vector<8x128xbf16>
    %cst_42 = arith.constant dense<0.000000e+00> : vector<8x384xf32>
    %147 = tpu.matmul %146, %3, %cst_42 {dimension_numbers = #tpu.dot_dimension_numbers<[1], [0], [0], [1], [0, 0, 1, 1], [], []>} : vector<8x128xbf16>, vector<128x384xbf16>, vector<8x384xf32> -> vector<8x384xf32>
    %c4 = arith.constant 4 : index
    %c0_43 = arith.constant 0 : index
    %c0_44 = arith.constant 0 : index
    %148 = vector.load %arg2[%c4, %c0_43, %c0_44] : memref<8x8x384xf32, #tpu.memory_space<vmem>>, vector<1x8x384xf32>
    %149 = vector.shape_cast %148 : vector<1x8x384xf32> to vector<8x384xf32>
    %150 = vector.extract_strided_slice %149 {offsets = [0, 0], sizes = [8, 128], strides = [1, 1]} : vector<8x384xf32> to vector<8x128xf32>
    %151 = vector.extract_strided_slice %147 {offsets = [0, 0], sizes = [8, 128], strides = [1, 1]} : vector<8x384xf32> to vector<8x128xf32>
    %152 = arith.addf %150, %151 : vector<8x128xf32>
    %153 = arith.negf %152 : vector<8x128xf32>
    %154 = math.exp %153 : vector<8x128xf32>
    %cst_45 = arith.constant 1.000000e+00 : f32
    %155 = vector.broadcast %cst_45 : f32 to vector<8x128xf32>
    %156 = arith.addf %155, %154 : vector<8x128xf32>
    %157 = arith.divf %155, %156 : vector<8x128xf32>
    %158 = vector.extract_strided_slice %149 {offsets = [0, 128], sizes = [8, 128], strides = [1, 1]} : vector<8x384xf32> to vector<8x128xf32>
    %159 = vector.extract_strided_slice %147 {offsets = [0, 128], sizes = [8, 128], strides = [1, 1]} : vector<8x384xf32> to vector<8x128xf32>
    %160 = arith.addf %158, %159 : vector<8x128xf32>
    %161 = arith.negf %160 : vector<8x128xf32>
    %162 = math.exp %161 : vector<8x128xf32>
    %cst_46 = arith.constant 1.000000e+00 : f32
    %163 = vector.broadcast %cst_46 : f32 to vector<8x128xf32>
    %164 = arith.addf %163, %162 : vector<8x128xf32>
    %165 = arith.divf %163, %164 : vector<8x128xf32>
    %166 = vector.extract_strided_slice %149 {offsets = [0, 256], sizes = [8, 128], strides = [1, 1]} : vector<8x384xf32> to vector<8x128xf32>
    %167 = vector.extract_strided_slice %147 {offsets = [0, 256], sizes = [8, 128], strides = [1, 1]} : vector<8x384xf32> to vector<8x128xf32>
    %168 = vector.broadcast %4 : vector<1x128xf32> to vector<8x128xf32>
    %169 = arith.addf %167, %168 : vector<8x128xf32>
    %170 = arith.mulf %157, %169 : vector<8x128xf32>
    %171 = arith.addf %166, %170 : vector<8x128xf32>
    %172 = math.tanh %171 : vector<8x128xf32>
    %cst_47 = arith.constant 1.000000e+00 : f32
    %173 = vector.broadcast %cst_47 : f32 to vector<8x128xf32>
    %174 = arith.subf %173, %165 : vector<8x128xf32>
    %175 = arith.mulf %174, %172 : vector<8x128xf32>
    %176 = arith.mulf %165, %142 : vector<8x128xf32>
    %177 = arith.addf %175, %176 : vector<8x128xf32>
    %c4_48 = arith.constant 4 : index
    %c0_49 = arith.constant 0 : index
    %c0_50 = arith.constant 0 : index
    %178 = vector.load %arg5[%c4_48, %c0_49, %c0_50] : memref<8x8x128xf32, #tpu.memory_space<vmem>>, vector<1x8x128xf32>
    %179 = vector.shape_cast %178 : vector<1x8x128xf32> to vector<8x128xf32>
    %180 = vector.shape_cast %177 : vector<8x128xf32> to vector<1x8x128xf32>
    tpu.vector_store %arg5[%c4_48, %c0_49, %c0_50], %180 {strides = array<i32>} : memref<8x8x128xf32, #tpu.memory_space<vmem>>, vector<1x8x128xf32>,
    %181 = arith.truncf %177 : vector<8x128xf32> to vector<8x128xbf16>
    %cst_51 = arith.constant dense<0.000000e+00> : vector<8x384xf32>
    %182 = tpu.matmul %181, %3, %cst_51 {dimension_numbers = #tpu.dot_dimension_numbers<[1], [0], [0], [1], [0, 0, 1, 1], [], []>} : vector<8x128xbf16>, vector<128x384xbf16>, vector<8x384xf32> -> vector<8x384xf32>
    %c5 = arith.constant 5 : index
    %c0_52 = arith.constant 0 : index
    %c0_53 = arith.constant 0 : index
    %183 = vector.load %arg2[%c5, %c0_52, %c0_53] : memref<8x8x384xf32, #tpu.memory_space<vmem>>, vector<1x8x384xf32>
    %184 = vector.shape_cast %183 : vector<1x8x384xf32> to vector<8x384xf32>
    %185 = vector.extract_strided_slice %184 {offsets = [0, 0], sizes = [8, 128], strides = [1, 1]} : vector<8x384xf32> to vector<8x128xf32>
    %186 = vector.extract_strided_slice %182 {offsets = [0, 0], sizes = [8, 128], strides = [1, 1]} : vector<8x384xf32> to vector<8x128xf32>
    %187 = arith.addf %185, %186 : vector<8x128xf32>
    %188 = arith.negf %187 : vector<8x128xf32>
    %189 = math.exp %188 : vector<8x128xf32>
    %cst_54 = arith.constant 1.000000e+00 : f32
    %190 = vector.broadcast %cst_54 : f32 to vector<8x128xf32>
    %191 = arith.addf %190, %189 : vector<8x128xf32>
    %192 = arith.divf %190, %191 : vector<8x128xf32>
    %193 = vector.extract_strided_slice %184 {offsets = [0, 128], sizes = [8, 128], strides = [1, 1]} : vector<8x384xf32> to vector<8x128xf32>
    %194 = vector.extract_strided_slice %182 {offsets = [0, 128], sizes = [8, 128], strides = [1, 1]} : vector<8x384xf32> to vector<8x128xf32>
    %195 = arith.addf %193, %194 : vector<8x128xf32>
    %196 = arith.negf %195 : vector<8x128xf32>
    %197 = math.exp %196 : vector<8x128xf32>
    %cst_55 = arith.constant 1.000000e+00 : f32
    %198 = vector.broadcast %cst_55 : f32 to vector<8x128xf32>
    %199 = arith.addf %198, %197 : vector<8x128xf32>
    %200 = arith.divf %198, %199 : vector<8x128xf32>
    %201 = vector.extract_strided_slice %184 {offsets = [0, 256], sizes = [8, 128], strides = [1, 1]} : vector<8x384xf32> to vector<8x128xf32>
    %202 = vector.extract_strided_slice %182 {offsets = [0, 256], sizes = [8, 128], strides = [1, 1]} : vector<8x384xf32> to vector<8x128xf32>
    %203 = vector.broadcast %4 : vector<1x128xf32> to vector<8x128xf32>
    %204 = arith.addf %202, %203 : vector<8x128xf32>
    %205 = arith.mulf %192, %204 : vector<8x128xf32>
    %206 = arith.addf %201, %205 : vector<8x128xf32>
    %207 = math.tanh %206 : vector<8x128xf32>
    %cst_56 = arith.constant 1.000000e+00 : f32
    %208 = vector.broadcast %cst_56 : f32 to vector<8x128xf32>
    %209 = arith.subf %208, %200 : vector<8x128xf32>
    %210 = arith.mulf %209, %207 : vector<8x128xf32>
    %211 = arith.mulf %200, %177 : vector<8x128xf32>
    %212 = arith.addf %210, %211 : vector<8x128xf32>
    %c5_57 = arith.constant 5 : index
    %c0_58 = arith.constant 0 : index
    %c0_59 = arith.constant 0 : index
    %213 = vector.load %arg5[%c5_57, %c0_58, %c0_59] : memref<8x8x128xf32, #tpu.memory_space<vmem>>, vector<1x8x128xf32>
    %214 = vector.shape_cast %213 : vector<1x8x128xf32> to vector<8x128xf32>
    %215 = vector.shape_cast %212 : vector<8x128xf32> to vector<1x8x128xf32>
    tpu.vector_store %arg5[%c5_57, %c0_58, %c0_59], %215 {strides = array<i32>} : memref<8x8x128xf32, #tpu.memory_space<vmem>>, vector<1x8x128xf32>,
    %216 = arith.truncf %212 : vector<8x128xf32> to vector<8x128xbf16>
    %cst_60 = arith.constant dense<0.000000e+00> : vector<8x384xf32>
    %217 = tpu.matmul %216, %3, %cst_60 {dimension_numbers = #tpu.dot_dimension_numbers<[1], [0], [0], [1], [0, 0, 1, 1], [], []>} : vector<8x128xbf16>, vector<128x384xbf16>, vector<8x384xf32> -> vector<8x384xf32>
    %c6 = arith.constant 6 : index
    %c0_61 = arith.constant 0 : index
    %c0_62 = arith.constant 0 : index
    %218 = vector.load %arg2[%c6, %c0_61, %c0_62] : memref<8x8x384xf32, #tpu.memory_space<vmem>>, vector<1x8x384xf32>
    %219 = vector.shape_cast %218 : vector<1x8x384xf32> to vector<8x384xf32>
    %220 = vector.extract_strided_slice %219 {offsets = [0, 0], sizes = [8, 128], strides = [1, 1]} : vector<8x384xf32> to vector<8x128xf32>
    %221 = vector.extract_strided_slice %217 {offsets = [0, 0], sizes = [8, 128], strides = [1, 1]} : vector<8x384xf32> to vector<8x128xf32>
    %222 = arith.addf %220, %221 : vector<8x128xf32>
    %223 = arith.negf %222 : vector<8x128xf32>
    %224 = math.exp %223 : vector<8x128xf32>
    %cst_63 = arith.constant 1.000000e+00 : f32
    %225 = vector.broadcast %cst_63 : f32 to vector<8x128xf32>
    %226 = arith.addf %225, %224 : vector<8x128xf32>
    %227 = arith.divf %225, %226 : vector<8x128xf32>
    %228 = vector.extract_strided_slice %219 {offsets = [0, 128], sizes = [8, 128], strides = [1, 1]} : vector<8x384xf32> to vector<8x128xf32>
    %229 = vector.extract_strided_slice %217 {offsets = [0, 128], sizes = [8, 128], strides = [1, 1]} : vector<8x384xf32> to vector<8x128xf32>
    %230 = arith.addf %228, %229 : vector<8x128xf32>
    %231 = arith.negf %230 : vector<8x128xf32>
    %232 = math.exp %231 : vector<8x128xf32>
    %cst_64 = arith.constant 1.000000e+00 : f32
    %233 = vector.broadcast %cst_64 : f32 to vector<8x128xf32>
    %234 = arith.addf %233, %232 : vector<8x128xf32>
    %235 = arith.divf %233, %234 : vector<8x128xf32>
    %236 = vector.extract_strided_slice %219 {offsets = [0, 256], sizes = [8, 128], strides = [1, 1]} : vector<8x384xf32> to vector<8x128xf32>
    %237 = vector.extract_strided_slice %217 {offsets = [0, 256], sizes = [8, 128], strides = [1, 1]} : vector<8x384xf32> to vector<8x128xf32>
    %238 = vector.broadcast %4 : vector<1x128xf32> to vector<8x128xf32>
    %239 = arith.addf %237, %238 : vector<8x128xf32>
    %240 = arith.mulf %227, %239 : vector<8x128xf32>
    %241 = arith.addf %236, %240 : vector<8x128xf32>
    %242 = math.tanh %241 : vector<8x128xf32>
    %cst_65 = arith.constant 1.000000e+00 : f32
    %243 = vector.broadcast %cst_65 : f32 to vector<8x128xf32>
    %244 = arith.subf %243, %235 : vector<8x128xf32>
    %245 = arith.mulf %244, %242 : vector<8x128xf32>
    %246 = arith.mulf %235, %212 : vector<8x128xf32>
    %247 = arith.addf %245, %246 : vector<8x128xf32>
    %c6_66 = arith.constant 6 : index
    %c0_67 = arith.constant 0 : index
    %c0_68 = arith.constant 0 : index
    %248 = vector.load %arg5[%c6_66, %c0_67, %c0_68] : memref<8x8x128xf32, #tpu.memory_space<vmem>>, vector<1x8x128xf32>
    %249 = vector.shape_cast %248 : vector<1x8x128xf32> to vector<8x128xf32>
    %250 = vector.shape_cast %247 : vector<8x128xf32> to vector<1x8x128xf32>
    tpu.vector_store %arg5[%c6_66, %c0_67, %c0_68], %250 {strides = array<i32>} : memref<8x8x128xf32, #tpu.memory_space<vmem>>, vector<1x8x128xf32>,
    %251 = arith.truncf %247 : vector<8x128xf32> to vector<8x128xbf16>
    %cst_69 = arith.constant dense<0.000000e+00> : vector<8x384xf32>
    %252 = tpu.matmul %251, %3, %cst_69 {dimension_numbers = #tpu.dot_dimension_numbers<[1], [0], [0], [1], [0, 0, 1, 1], [], []>} : vector<8x128xbf16>, vector<128x384xbf16>, vector<8x384xf32> -> vector<8x384xf32>
    %c7 = arith.constant 7 : index
    %c0_70 = arith.constant 0 : index
    %c0_71 = arith.constant 0 : index
    %253 = vector.load %arg2[%c7, %c0_70, %c0_71] : memref<8x8x384xf32, #tpu.memory_space<vmem>>, vector<1x8x384xf32>
    %254 = vector.shape_cast %253 : vector<1x8x384xf32> to vector<8x384xf32>
    %255 = vector.extract_strided_slice %254 {offsets = [0, 0], sizes = [8, 128], strides = [1, 1]} : vector<8x384xf32> to vector<8x128xf32>
    %256 = vector.extract_strided_slice %252 {offsets = [0, 0], sizes = [8, 128], strides = [1, 1]} : vector<8x384xf32> to vector<8x128xf32>
    %257 = arith.addf %255, %256 : vector<8x128xf32>
    %258 = arith.negf %257 : vector<8x128xf32>
    %259 = math.exp %258 : vector<8x128xf32>
    %cst_72 = arith.constant 1.000000e+00 : f32
    %260 = vector.broadcast %cst_72 : f32 to vector<8x128xf32>
    %261 = arith.addf %260, %259 : vector<8x128xf32>
    %262 = arith.divf %260, %261 : vector<8x128xf32>
    %263 = vector.extract_strided_slice %254 {offsets = [0, 128], sizes = [8, 128], strides = [1, 1]} : vector<8x384xf32> to vector<8x128xf32>
    %264 = vector.extract_strided_slice %252 {offsets = [0, 128], sizes = [8, 128], strides = [1, 1]} : vector<8x384xf32> to vector<8x128xf32>
    %265 = arith.addf %263, %264 : vector<8x128xf32>
    %266 = arith.negf %265 : vector<8x128xf32>
    %267 = math.exp %266 : vector<8x128xf32>
    %cst_73 = arith.constant 1.000000e+00 : f32
    %268 = vector.broadcast %cst_73 : f32 to vector<8x128xf32>
    %269 = arith.addf %268, %267 : vector<8x128xf32>
    %270 = arith.divf %268, %269 : vector<8x128xf32>
    %271 = vector.extract_strided_slice %254 {offsets = [0, 256], sizes = [8, 128], strides = [1, 1]} : vector<8x384xf32> to vector<8x128xf32>
    %272 = vector.extract_strided_slice %252 {offsets = [0, 256], sizes = [8, 128], strides = [1, 1]} : vector<8x384xf32> to vector<8x128xf32>
    %273 = vector.broadcast %4 : vector<1x128xf32> to vector<8x128xf32>
    %274 = arith.addf %272, %273 : vector<8x128xf32>
    %275 = arith.mulf %262, %274 : vector<8x128xf32>
    %276 = arith.addf %271, %275 : vector<8x128xf32>
    %277 = math.tanh %276 : vector<8x128xf32>
    %cst_74 = arith.constant 1.000000e+00 : f32
    %278 = vector.broadcast %cst_74 : f32 to vector<8x128xf32>
    %279 = arith.subf %278, %270 : vector<8x128xf32>
    %280 = arith.mulf %279, %277 : vector<8x128xf32>
    %281 = arith.mulf %270, %247 : vector<8x128xf32>
    %282 = arith.addf %280, %281 : vector<8x128xf32>
    %c7_75 = arith.constant 7 : index
    %c0_76 = arith.constant 0 : index
    %c0_77 = arith.constant 0 : index
    %283 = vector.load %arg5[%c7_75, %c0_76, %c0_77] : memref<8x8x128xf32, #tpu.memory_space<vmem>>, vector<1x8x128xf32>
    %284 = vector.shape_cast %283 : vector<1x8x128xf32> to vector<8x128xf32>
    %285 = vector.shape_cast %282 : vector<8x128xf32> to vector<1x8x128xf32>
    tpu.vector_store %arg5[%c7_75, %c0_76, %c0_77], %285 {strides = array<i32>} : memref<8x8x128xf32, #tpu.memory_space<vmem>>, vector<1x8x128xf32>,
    %c0_78 = arith.constant 0 : index
    %c0_79 = arith.constant 0 : index
    %286 = vector.load %arg7[%c0_78, %c0_79] : memref<8x128xf32, #tpu.memory_space<vmem>>, vector<8x128xf32>
    tpu.vector_store %arg7[%c0_78, %c0_79], %282 {strides = array<i32>} : memref<8x128xf32, #tpu.memory_space<vmem>>, vector<8x128xf32>,
    %c0_i32_80 = arith.constant 0 : i32
    %287 = arith.cmpi eq, %arg1, %c0_i32_80 : i32
    %288 = arith.extui %287 : i1 to i32
    %c0_i32_81 = arith.constant 0 : i32
    %289 = arith.cmpi ne, %288, %c0_i32_81 : i32
    scf.if %289 {
      %c0_82 = arith.constant 0 : index
      %c0_83 = arith.constant 0 : index
      %290 = vector.load %arg6[%c0_82, %c0_83] : memref<8x128xf32, #tpu.memory_space<vmem>>, vector<8x128xf32>
      tpu.vector_store %arg6[%c0_82, %c0_83], %282 {strides = array<i32>} : memref<8x128xf32, #tpu.memory_space<vmem>>, vector<8x128xf32>,
    } else {
    }
    return
  }
  func.func @transform_0(%arg0: i32, %arg1: i32) -> (i32, i32, i32) {
    %c0_i32 = arith.constant 0 : i32
    %c0_i32_0 = arith.constant 0 : i32
    return %arg1, %arg0, %c0_i32 : i32, i32, i32
  }
  func.func @transform_1(%arg0: i32, %arg1: i32) -> (i32, i32) {
    %c0_i32 = arith.constant 0 : i32
    %c0_i32_0 = arith.constant 0 : i32
    %c0_i32_1 = arith.constant 0 : i32
    return %c0_i32, %c0_i32_0 : i32, i32
  }
  func.func @transform_2(%arg0: i32, %arg1: i32) -> (i32, i32) {
    %c0_i32 = arith.constant 0 : i32
    %c0_i32_0 = arith.constant 0 : i32
    %c0_i32_1 = arith.constant 0 : i32
    return %c0_i32, %c0_i32_0 : i32, i32
  }
  func.func @transform_3(%arg0: i32, %arg1: i32) -> (i32, i32, i32) {
    %c0_i32 = arith.constant 0 : i32
    %c0_i32_0 = arith.constant 0 : i32
    return %arg1, %arg0, %c0_i32 : i32, i32, i32
  }
  func.func @transform_4(%arg0: i32, %arg1: i32) -> (i32, i32) {
    %c0_i32 = arith.constant 0 : i32
    %c0_i32_0 = arith.constant 0 : i32
    return %arg0, %c0_i32 : i32, i32
  }
}

</mosaic_0001>

<bundles_post_ra>
// kernel: seq2seq_enco_forward.2
= control target key start
LH: loop header
LB: loop body
LE: loop exit
PB: predicated region body
PF: predicated region fallthrough
CT: control target
= control target key end

     0   :  { %v1504_v1 = vmov 0.0   ;;  %v1505_v2 = vmov 0   ;;  %vm1506_vm0 = vmmov 0   ;;  %v1507_v25 = vmov 0.0|0.0   ;;  %s2093_s1 = inlined_call_operand.vmem [shape: bf16[128,384], index: 1, kind: input, shape index: {}]   ;;  %s2094_s0 = inlined_call_operand.vmem [shape: f32[8,8,384], index: 0, kind: input, shape index: {}]   ;;  %s2095_s2 = inlined_call_operand.vmem [shape: f32[1,128], index: 2, kind: input, shape index: {}]   ;;  %s2096_s3 = inlined_call_operand.vmem [shape: f32[8,8,128], index: 3, kind: output, shape index: {0}]   ;;  %s2097_s4 = inlined_call_operand.vmem [shape: f32[8,128], index: 4, kind: output, shape index: {1}]  }
   0x1   :  { %v1536_v0 = vld [vmem:[%s2093_s1 + $0xac] ss:$12 sps:$4 sm:$0xff]   ;;  %1222 = vmatprep.subr.bf16.mxu1 %v1504_v1  ;;  %217 = vmatprep.mubr.bf16.mxu0 %v1505_v2  ;;  %v1543_v3 = vld [vmem:[%s2093_s1 + $0xa8] ss:$12 sps:$4 sm:$0xff]   ;;  %v1557_v5 = vld [vmem:[%s2093_s1 + $0x90] ss:$12 sps:$4 sm:$0xff]  }
   0x2   :  { %1238 = vmatprep.mubr.msk.bf16.mxu1 %vm1506_vm0, %v1504_v1  ;;  %185 = vmatprep.subr.bf16.mxu0 %v1536_v0  ;;  %v1551_v4 = vld [vmem:[%s2093_s1 + $0x94] ss:$12 sps:$4 sm:$0xff]   ;;  %v1563_v6 = vld [vmem:[%s2093_s1 + $0x7c] ss:$12 sps:$4 sm:$0xff]   ;;  %v1569_v7 = vld [vmem:[%s2093_s1 + $0x78] ss:$12 sps:$4 sm:$0xff]  }
   0x3   :  { %186 = vmatpush1.bf16.msra.mxu0 %v1543_v3  ;;  %v1575_v8 = vld [vmem:[%s2093_s1 + $0x64] ss:$12 sps:$4 sm:$0xff]   ;;  %v1586_v10 = vld [vmem:[%s2093_s1 + $0x60] ss:$12 sps:$4 sm:$0xff]   ;;  %v1604_v13 = vld [vmem:[%s2093_s1 + $0x48] ss:$12 sps:$4 sm:$0xff]  }
   0x4   :  { %187 = vmatprep.subr.bf16.mxu0 %v1551_v4  ;;  %v1580_v9 = vld [vmem:[%s2093_s1 + $0xb0] ss:$12 sps:$4 sm:$0xff]   ;;  %v1591_v11 = vld [vmem:[%s2093_s1 + $0x4c] ss:$12 sps:$4 sm:$0xff]   ;;  %v1610_v14 = vld [vmem:[%s2093_s1 + $0x34] ss:$12 sps:$4 sm:$0xff]  }
   0x5   :  { %1223 = vmatpush3.bf16.msra.mxu1 %v1580_v9  ;;  %v1598_v12 = vld [vmem:[%s2093_s1 + $0x98] ss:$12 sps:$4 sm:$0xff]   ;;  %v1617_v15 = vld [vmem:[%s2093_s1 + $0x80] ss:$12 sps:$4 sm:$0xff]   ;;  %v1624_v16 = vld [vmem:[%s2093_s1 + $0x30] ss:$12 sps:$4 sm:$0xff]  }
   0x6   :  { %1224 = vmatprep.subr.bf16.mxu1 %v1504_v1  ;;  %v1630_v17 = vld [vmem:[%s2093_s1 + $0x1c] ss:$12 sps:$4 sm:$0xff]   ;;  %v1643_v19 = vld [vmem:[%s2093_s1 + $0x18] ss:$12 sps:$4 sm:$0xff]   ;;  %v1662_v22 = vld [vmem:[%s2093_s1] ss:$12 sps:$4 sm:$0xff]  }
   0x7   :  { %188 = vmatpush1.bf16.msra.mxu0 %v1557_v5  ;;  %v1636_v18 = vld [vmem:[%s2093_s1 + $0x68] ss:$12 sps:$4 sm:$0xff]   ;;  %v1649_v20 = vld [vmem:[%s2093_s1 + $0x4] ss:$12 sps:$4 sm:$0xff]   ;;  %v1677_v24 = vld [vmem:[%s2093_s1 + $0x20] ss:$12 sps:$4 sm:$0xff]  }
   0x8   :  { %189 = vmatprep.subr.bf16.mxu0 %v1563_v6  ;;  %v1655_v21 = vld [vmem:[%s2093_s1 + $0x50] ss:$12 sps:$4 sm:$0xff]   ;;  %v1669_v23 = vld [vmem:[%s2093_s1 + $0x38] ss:$12 sps:$4 sm:$0xff]   ;;  %v1687_v26 = vld [vmem:[%s2093_s1 + $0x8] ss:$12 sps:$4 sm:$0xff]  }
   0x9   :  { %1225 = vmatpush3.bf16.msra.mxu1 %v1598_v12  ;;  %v266_v27 = vld [vmem:[%s2094_s0] sm:$0xff]  ;;  %v267_v32 = vld [vmem:[%s2094_s0 + $0x8] sm:$0xff]  ;;  %v268_v48 = vld [vmem:[%s2094_s0 + $0x10] sm:$0xff] }
   0xa   :  { %1226 = vmatprep.subr.bf16.mxu1 %v1504_v1  ;;  %v1734_v44 = vld [vmem:[%s2095_s2] ss:$0 sm:$0xff]  ;;  %v1108_v58 = vld [vmem:[%s2094_s0 + $0x18] sm:$0xff] }
   0xb   :  { %190 = vmatpush1.bf16.msra.mxu0 %v1569_v7 }
   0xc   :  { %191 = vmatprep.subr.bf16.mxu0 %v1575_v8 }
   0xd   :  { %1227 = vmatpush3.bf16.msra.mxu1 %v1617_v15 }
   0xe   :  { %1228 = vmatprep.subr.bf16.mxu1 %v1504_v1 }
   0xf   :  { %192 = vmatpush1.bf16.msra.mxu0 %v1586_v10 }
  0x10   :  { %193 = vmatprep.subr.bf16.mxu0 %v1591_v11 }
  0x11   :  { %1229 = vmatpush3.bf16.msra.mxu1 %v1636_v18 }
  0x12   :  { %1230 = vmatprep.subr.bf16.mxu1 %v1504_v1 }
  0x13   :  { %194 = vmatpush1.bf16.msra.mxu0 %v1604_v13 }
  0x14   :  { %195 = vmatprep.subr.bf16.mxu0 %v1610_v14 }
  0x15   :  { %1231 = vmatpush3.bf16.msra.mxu1 %v1655_v21 }
  0x16   :  { %1232 = vmatprep.subr.bf16.mxu1 %v1504_v1 }
  0x17   :  { %196 = vmatpush1.bf16.msra.mxu0 %v1624_v16 }
  0x18   :  { %197 = vmatprep.subr.bf16.mxu0 %v1630_v17 }
  0x19   :  { %1233 = vmatpush3.bf16.msra.mxu1 %v1669_v23 }
  0x1a   :  { %1234 = vmatprep.subr.bf16.mxu1 %v1504_v1 }
  0x1b   :  { %198 = vmatpush1.bf16.msra.mxu0 %v1643_v19 }
  0x1c   :  { %199 = vmatprep.subr.bf16.mxu0 %v1649_v20 }
  0x1d   :  { %1235 = vmatpush3.bf16.msra.mxu1 %v1677_v24 }
  0x1e   :  { %1236 = vmatprep.subr.bf16.mxu1 %v1504_v1 }
  0x1f   :  { %200 = vmatpush1.bf16.msra.mxu0 %v1662_v22 }
  0x20   :  { %299 = vmatprep.subr.bf16.mxu0 %v1536_v0 }
  0x21   :  { %1237 = vmatpush3.bf16.msra.mxu1 %v1687_v26 }
  0x22   :  { %218 = vmatmul.mubr.bf16.vlgmr.msra.gmra.mxu0 %v1507_v25  ;;  %1242 = vmatprep.subr.bf16.mxu1 %v1504_v1 }
  0x23   :  { %300 = vmatpush1.bf16.msra.mxu0 %v1543_v3  ;;  %331 = vmatprep.mubr.bf16.mxu0 %v1505_v2 }
  0x24   :  { %301 = vmatprep.subr.bf16.mxu0 %v1551_v4  ;;  %1239 = vmatmul.mubr.bf16.vlgmr.msra.gmra.mxu1 %v1507_v25 }
  0x25   :  { %1243 = vmatpush3.bf16.msra.mxu1 %v1580_v9  ;;  %1258 = vmatprep.mubr.msk.bf16.mxu1 %vm1506_vm0, %v1504_v1 }
  0x26   :  { %1244 = vmatprep.subr.bf16.mxu1 %v1504_v1 }
  0x27   :  { %302 = vmatpush1.bf16.msra.mxu0 %v1557_v5 }
  0x28   :  { %303 = vmatprep.subr.bf16.mxu0 %v1563_v6 }
  0x29   :  { %1245 = vmatpush3.bf16.msra.mxu1 %v1598_v12 }
  0x2a   :  { %1246 = vmatprep.subr.bf16.mxu1 %v1504_v1 }
  0x2b   :  { %304 = vmatpush1.bf16.msra.mxu0 %v1569_v7 }
  0x2c   :  { %305 = vmatprep.subr.bf16.mxu0 %v1575_v8 }
  0x2d   :  { %1247 = vmatpush3.bf16.msra.mxu1 %v1617_v15 }
  0x2e   :  { %1248 = vmatprep.subr.bf16.mxu1 %v1504_v1 }
  0x2f   :  { %306 = vmatpush1.bf16.msra.mxu0 %v1586_v10 }
  0x30   :  { %307 = vmatprep.subr.bf16.mxu0 %v1591_v11 }
  0x31   :  { %1249 = vmatpush3.bf16.msra.mxu1 %v1636_v18 }
  0x32   :  { %1250 = vmatprep.subr.bf16.mxu1 %v1504_v1 }
  0x33   :  { %308 = vmatpush1.bf16.msra.mxu0 %v1604_v13 }
  0x34   :  { %309 = vmatprep.subr.bf16.mxu0 %v1610_v14 }
  0x35   :  { %1251 = vmatpush3.bf16.msra.mxu1 %v1655_v21 }
  0x36   :  { %1252 = vmatprep.subr.bf16.mxu1 %v1504_v1 }
  0x37   :  { %310 = vmatpush1.bf16.msra.mxu0 %v1624_v16 }
  0x38   :  { %311 = vmatprep.subr.bf16.mxu0 %v1630_v17 }
  0x39   :  { %1253 = vmatpush3.bf16.msra.mxu1 %v1669_v23 }
  0x3a   :  { %1254 = vmatprep.subr.bf16.mxu1 %v1504_v1 }
  0x3b   :  { %312 = vmatpush1.bf16.msra.mxu0 %v1643_v19 }
  0x3c   :  { %313 = vmatprep.subr.bf16.mxu0 %v1649_v20 }
  0x3d   :  { %1255 = vmatpush3.bf16.msra.mxu1 %v1677_v24 }
  0x3e   :  { %1256 = vmatprep.subr.bf16.mxu1 %v1504_v1 }
  0x3f   :  { %314 = vmatpush1.bf16.msra.mxu0 %v1662_v22 }
  0x40   :  { %409 = vmatprep.subr.bf16.mxu0 %v1536_v0 }
  0x41   :  { %1257 = vmatpush3.bf16.msra.mxu1 %v1687_v26 }
  0x42   :  { %1262 = vmatprep.subr.bf16.mxu1 %v1504_v1 }
  0xe2   :  { %v219_v28 = vpop.f32.mrf.mxu0 }
  0xe3   :  { %v269_v29 = vadd.f32 %v266_v27, %v219_v28  ;;  %v1109_v27 = vld [vmem:[%s2094_s0 + $0x20] sm:$0xff] }
  0xe4   :  { %v221_v30 = vpop.f32.mrf.mxu0  ;;  %v260_v36 = vpop.f32.mrf.mxu1 }
  0xe5   :  { %v1105_v31 = vmul.f32 -1.442695, %v269_v29  ;;  %v276_v35 = vadd.f32 %v267_v32, %v221_v30  ;;  %v289_v46 = vadd.f32 %v1734_v44, %v260_v36 }
  0xe6   :  { %v223_v33 = vpop.f32.mrf.mxu0  ;;  %v1240_v38 = vpop.f32.mrf.mxu1 }
  0xe7   :  { %1418 = vpow2.f32 %v1105_v31  ;;  %v1106_v37 = vmul.f32 -1.442695, %v276_v35 }
  0xe8   :  { %v224_v34 = vpop.f32.mrf.mxu0  ;;  %v263_v39 = vpop.f32.mrf.mxu1 }
  0xe9   :  { %1420 = vpow2.f32 %v1106_v37 }
  0xea   :  { %v1241_v40 = vpop.f32.mrf.mxu1 }
  0xeb   :  { %v1110_v40 = vld [vmem:[%s2094_s0 + $0x28] sm:$0xff] }
  0xf4   :  { %v1419_v41 = vpop.eup %1418 }
  0xf5   :  { %v273_v42 = vadd.f32 1.0, %v1419_v41 }
  0xf6   :  { %v1421_v43 = vpop.eup %1420 }
  0xf7   :  { %1422 = vrcp.f32 %v273_v42  ;;  %v280_v45 = vadd.f32 1.0, %v1421_v43 }
  0xf9   :  { %1424 = vrcp.f32 %v280_v45 }
 0x104   :  { %v1423_v47 = vpop.eup %1422 }
 0x105   :  { %v290_v49 = vmul.f32 %v1423_v47, %v289_v46 }
 0x106   :  { %v1425_v51 = vpop.eup %1424 }
 0x107   :  { %v291_v50 = vadd.f32 %v290_v49, %v268_v48  ;;  %v293_v52 = vsub.f32 1.0, %v1425_v51  ;;  %v295_v55 = vmul.f32 0.0, %v1425_v51  ;;  %v1114_v51 = vld [vmem:[%s2094_s0 + $0x30] sm:$0xff] }
 0x109   :  { %1426 = vtanh.f32 %v291_v50 }
 0x116   :  { %v1427_v53 = vpop.eup %1426 }
 0x117   :  { %v294_v54 = vmul.f32 %v1427_v53, %v293_v52 }
 0x119   :  { %v1740_v56 = vadd.f32 %v295_v55, %v294_v54 }
 0x11b   :  { %297 = vst [vmem:[%s2096_s3] sm:$0xff] %v1740_v56  ;;  %v298_v57 = vpack.c.bf16 %v1740_v56, %v1740_v56 }
 0x11d   :  { %332 = vmatmul.mubr.bf16.vlgmr.msra.gmra.mxu0 %v298_v57  ;;  %1259 = vmatmul.mubr.bf16.vlgmr.msra.gmra.mxu1 %v298_v57 }
 0x11e   :  { %410 = vmatpush1.bf16.msra.mxu0 %v1543_v3  ;;  %1263 = vmatpush3.bf16.msra.mxu1 %v1580_v9 }
 0x11f   :  { %411 = vmatprep.subr.bf16.mxu0 %v1551_v4  ;;  %1264 = vmatprep.subr.bf16.mxu1 %v1504_v1 }
 0x120   :  { %441 = vmatprep.mubr.bf16.mxu0 %v1505_v2  ;;  %1278 = vmatprep.mubr.msk.bf16.mxu1 %vm1506_vm0, %v1504_v1 }
 0x122   :  { %412 = vmatpush1.bf16.msra.mxu0 %v1557_v5  ;;  %1265 = vmatpush3.bf16.msra.mxu1 %v1598_v12 }
 0x123   :  { %413 = vmatprep.subr.bf16.mxu0 %v1563_v6  ;;  %1266 = vmatprep.subr.bf16.mxu1 %v1504_v1 }
 0x126   :  { %414 = vmatpush1.bf16.msra.mxu0 %v1569_v7  ;;  %1267 = vmatpush3.bf16.msra.mxu1 %v1617_v15 }
 0x127   :  { %415 = vmatprep.subr.bf16.mxu0 %v1575_v8  ;;  %1268 = vmatprep.subr.bf16.mxu1 %v1504_v1 }
 0x12a   :  { %416 = vmatpush1.bf16.msra.mxu0 %v1586_v10  ;;  %1269 = vmatpush3.bf16.msra.mxu1 %v1636_v18 }
 0x12b   :  { %417 = vmatprep.subr.bf16.mxu0 %v1591_v11  ;;  %1270 = vmatprep.subr.bf16.mxu1 %v1504_v1 }
 0x12e   :  { %418 = vmatpush1.bf16.msra.mxu0 %v1604_v13  ;;  %1271 = vmatpush3.bf16.msra.mxu1 %v1655_v21 }
 0x12f   :  { %419 = vmatprep.subr.bf16.mxu0 %v1610_v14  ;;  %1272 = vmatprep.subr.bf16.mxu1 %v1504_v1 }
 0x132   :  { %420 = vmatpush1.bf16.msra.mxu0 %v1624_v16  ;;  %1273 = vmatpush3.bf16.msra.mxu1 %v1669_v23 }
 0x133   :  { %421 = vmatprep.subr.bf16.mxu0 %v1630_v17  ;;  %1274 = vmatprep.subr.bf16.mxu1 %v1504_v1 }
 0x136   :  { %422 = vmatpush1.bf16.msra.mxu0 %v1643_v19  ;;  %1275 = vmatpush3.bf16.msra.mxu1 %v1677_v24 }
 0x137   :  { %423 = vmatprep.subr.bf16.mxu0 %v1649_v20  ;;  %1276 = vmatprep.subr.bf16.mxu1 %v1504_v1 }
 0x13a   :  { %424 = vmatpush1.bf16.msra.mxu0 %v1662_v22  ;;  %1277 = vmatpush3.bf16.msra.mxu1 %v1687_v26 }
 0x13b   :  { %519 = vmatprep.subr.bf16.mxu0 %v1536_v0  ;;  %1282 = vmatprep.subr.bf16.mxu1 %v1504_v1 }
 0x1dd   :  { %v333_v59 = vpop.f32.mrf.mxu0  ;;  %v374_v60 = vpop.f32.mrf.mxu1 }
 0x1de   :  { %v384_v61 = vadd.f32 %v1108_v58, %v333_v59  ;;  %v398_v38 = vadd.f32 %v1734_v44, %v374_v60  ;;  %v1115_v58 = vld [vmem:[%s2094_s0 + $0x38] sm:$0xff] }
 0x1df   :  { %v335_v62 = vpop.f32.mrf.mxu0  ;;  %v1260_v63 = vpop.f32.mrf.mxu1 }
 0x1e0   :  { %v1111_v25 = vmul.f32 -1.442695, %v384_v61  ;;  %v391_v32 = vadd.f32 %v1109_v27, %v335_v62 }
 0x1e1   :  { %v337_v28 = vpop.f32.mrf.mxu0  ;;  %v377_v29 = vpop.f32.mrf.mxu1 }
 0x1e2   :  { %1428 = vpow2.f32 %v1111_v25  ;;  %v1112_v33 = vmul.f32 -1.442695, %v391_v32 }
 0x1e3   :  { %v338_v30 = vpop.f32.mrf.mxu0  ;;  %v1261_v31 = vpop.f32.mrf.mxu1 }
 0x1e4   :  { %1430 = vpow2.f32 %v1112_v33  ;;  %v1116_v33 = vld [vmem:[%s2094_s0 + $0x40] sm:$0xff] }
 0x1ef   :  { %v1429_v34 = vpop.eup %1428 }
 0x1f0   :  { %v388_v35 = vadd.f32 1.0, %v1429_v34 }
 0x1f1   :  { %v1431_v36 = vpop.eup %1430 }
 0x1f2   :  { %1432 = vrcp.f32 %v388_v35  ;;  %v395_v37 = vadd.f32 1.0, %v1431_v36 }
 0x1f4   :  { %1434 = vrcp.f32 %v395_v37 }
 0x1ff   :  { %v1433_v39 = vpop.eup %1432 }
 0x200   :  { %v399_v41 = vmul.f32 %v1433_v39, %v398_v38 }
 0x201   :  { %v1435_v43 = vpop.eup %1434 }
 0x202   :  { %v400_v42 = vadd.f32 %v1110_v40, %v399_v41  ;;  %v402_v45 = vsub.f32 1.0, %v1435_v43  ;;  %v404_v48 = vmul.f32 %v1435_v43, %v1740_v56  ;;  %v1120_v43 = vld [vmem:[%s2094_s0 + $0x48] sm:$0xff] }
 0x204   :  { %1436 = vtanh.f32 %v400_v42 }
 0x211   :  { %v1437_v46 = vpop.eup %1436 }
 0x212   :  { %v403_v47 = vmul.f32 %v1437_v46, %v402_v45 }
 0x214   :  { %v1794_v49 = vadd.f32 %v404_v48, %v403_v47 }
 0x216   :  { %1113 = vst [vmem:[%s2096_s3 + $0x8] sm:$0xff] %v1794_v49  ;;  %v408_v50 = vpack.c.bf16 %v1794_v49, %v1794_v49 }
 0x218   :  { %442 = vmatmul.mubr.bf16.vlgmr.msra.gmra.mxu0 %v408_v50  ;;  %1279 = vmatmul.mubr.bf16.vlgmr.msra.gmra.mxu1 %v408_v50 }
 0x219   :  { %520 = vmatpush1.bf16.msra.mxu0 %v1543_v3  ;;  %1283 = vmatpush3.bf16.msra.mxu1 %v1580_v9 }
 0x21a   :  { %521 = vmatprep.subr.bf16.mxu0 %v1551_v4  ;;  %1284 = vmatprep.subr.bf16.mxu1 %v1504_v1 }
 0x21b   :  { %551 = vmatprep.mubr.bf16.mxu0 %v1505_v2  ;;  %1298 = vmatprep.mubr.msk.bf16.mxu1 %vm1506_vm0, %v1504_v1 }
 0x21d   :  { %522 = vmatpush1.bf16.msra.mxu0 %v1557_v5  ;;  %1285 = vmatpush3.bf16.msra.mxu1 %v1598_v12 }
 0x21e   :  { %523 = vmatprep.subr.bf16.mxu0 %v1563_v6  ;;  %1286 = vmatprep.subr.bf16.mxu1 %v1504_v1 }
 0x221   :  { %524 = vmatpush1.bf16.msra.mxu0 %v1569_v7  ;;  %1287 = vmatpush3.bf16.msra.mxu1 %v1617_v15 }
 0x222   :  { %525 = vmatprep.subr.bf16.mxu0 %v1575_v8  ;;  %1288 = vmatprep.subr.bf16.mxu1 %v1504_v1 }
 0x225   :  { %526 = vmatpush1.bf16.msra.mxu0 %v1586_v10  ;;  %1289 = vmatpush3.bf16.msra.mxu1 %v1636_v18 }
 0x226   :  { %527 = vmatprep.subr.bf16.mxu0 %v1591_v11  ;;  %1290 = vmatprep.subr.bf16.mxu1 %v1504_v1 }
 0x229   :  { %528 = vmatpush1.bf16.msra.mxu0 %v1604_v13  ;;  %1291 = vmatpush3.bf16.msra.mxu1 %v1655_v21 }
 0x22a   :  { %529 = vmatprep.subr.bf16.mxu0 %v1610_v14  ;;  %1292 = vmatprep.subr.bf16.mxu1 %v1504_v1 }
 0x22d   :  { %530 = vmatpush1.bf16.msra.mxu0 %v1624_v16  ;;  %1293 = vmatpush3.bf16.msra.mxu1 %v1669_v23 }
 0x22e   :  { %531 = vmatprep.subr.bf16.mxu0 %v1630_v17  ;;  %1294 = vmatprep.subr.bf16.mxu1 %v1504_v1 }
 0x231   :  { %532 = vmatpush1.bf16.msra.mxu0 %v1643_v19  ;;  %1295 = vmatpush3.bf16.msra.mxu1 %v1677_v24 }
 0x232   :  { %533 = vmatprep.subr.bf16.mxu0 %v1649_v20  ;;  %1296 = vmatprep.subr.bf16.mxu1 %v1504_v1 }
 0x235   :  { %534 = vmatpush1.bf16.msra.mxu0 %v1662_v22  ;;  %1297 = vmatpush3.bf16.msra.mxu1 %v1687_v26 }
 0x236   :  { %629 = vmatprep.subr.bf16.mxu0 %v1536_v0  ;;  %1302 = vmatprep.subr.bf16.mxu1 %v1504_v1 }
 0x2d8   :  { %v443_v52 = vpop.f32.mrf.mxu0  ;;  %v484_v53 = vpop.f32.mrf.mxu1 }
 0x2d9   :  { %v494_v54 = vadd.f32 %v1114_v51, %v443_v52  ;;  %v508_v31 = vadd.f32 %v1734_v44, %v484_v53  ;;  %v1121_v51 = vld [vmem:[%s2094_s0 + $0x50] sm:$0xff] }
 0x2da   :  { %v445_v55 = vpop.f32.mrf.mxu0  ;;  %v1280_v56 = vpop.f32.mrf.mxu1 }
 0x2db   :  { %v1117_v57 = vmul.f32 -1.442695, %v494_v54  ;;  %v501_v63 = vadd.f32 %v1115_v58, %v445_v55 }
 0x2dc   :  { %v447_v59 = vpop.f32.mrf.mxu0  ;;  %v487_v60 = vpop.f32.mrf.mxu1 }
 0x2dd   :  { %1438 = vpow2.f32 %v1117_v57  ;;  %v1118_v25 = vmul.f32 -1.442695, %v501_v63 }
 0x2de   :  { %v448_v61 = vpop.f32.mrf.mxu0  ;;  %v1281_v62 = vpop.f32.mrf.mxu1 }
 0x2df   :  { %1440 = vpow2.f32 %v1118_v25  ;;  %v1122_v25 = vld [vmem:[%s2094_s0 + $0x58] sm:$0xff] }
 0x2ea   :  { %v1439_v27 = vpop.eup %1438 }
 0x2eb   :  { %v498_v28 = vadd.f32 1.0, %v1439_v27 }
 0x2ec   :  { %v1441_v29 = vpop.eup %1440 }
 0x2ed   :  { %1442 = vrcp.f32 %v498_v28  ;;  %v505_v30 = vadd.f32 1.0, %v1441_v29 }
 0x2ef   :  { %1444 = vrcp.f32 %v505_v30 }
 0x2fa   :  { %v1443_v32 = vpop.eup %1442 }
 0x2fb   :  { %v509_v34 = vmul.f32 %v1443_v32, %v508_v31 }
 0x2fc   :  { %v1445_v36 = vpop.eup %1444 }
 0x2fd   :  { %v510_v35 = vadd.f32 %v1116_v33, %v509_v34  ;;  %v512_v37 = vsub.f32 1.0, %v1445_v36  ;;  %v514_v40 = vmul.f32 %v1445_v36, %v1794_v49  ;;  %v1126_v36 = vld [vmem:[%s2094_s0 + $0x60] sm:$0xff] }
 0x2ff   :  { %1446 = vtanh.f32 %v510_v35 }
 0x30c   :  { %v1447_v38 = vpop.eup %1446 }
 0x30d   :  { %v513_v39 = vmul.f32 %v1447_v38, %v512_v37 }
 0x30f   :  { %v1848_v41 = vadd.f32 %v514_v40, %v513_v39 }
 0x311   :  { %1119 = vst [vmem:[%s2096_s3 + $0x10] sm:$0xff] %v1848_v41  ;;  %v518_v42 = vpack.c.bf16 %v1848_v41, %v1848_v41 }
 0x313   :  { %552 = vmatmul.mubr.bf16.vlgmr.msra.gmra.mxu0 %v518_v42  ;;  %1299 = vmatmul.mubr.bf16.vlgmr.msra.gmra.mxu1 %v518_v42 }
 0x314   :  { %630 = vmatpush1.bf16.msra.mxu0 %v1543_v3  ;;  %1303 = vmatpush3.bf16.msra.mxu1 %v1580_v9 }
 0x315   :  { %631 = vmatprep.subr.bf16.mxu0 %v1551_v4  ;;  %1304 = vmatprep.subr.bf16.mxu1 %v1504_v1 }
 0x316   :  { %661 = vmatprep.mubr.bf16.mxu0 %v1505_v2  ;;  %1318 = vmatprep.mubr.msk.bf16.mxu1 %vm1506_vm0, %v1504_v1 }
 0x318   :  { %632 = vmatpush1.bf16.msra.mxu0 %v1557_v5  ;;  %1305 = vmatpush3.bf16.msra.mxu1 %v1598_v12 }
 0x319   :  { %633 = vmatprep.subr.bf16.mxu0 %v1563_v6  ;;  %1306 = vmatprep.subr.bf16.mxu1 %v1504_v1 }
 0x31c   :  { %634 = vmatpush1.bf16.msra.mxu0 %v1569_v7  ;;  %1307 = vmatpush3.bf16.msra.mxu1 %v1617_v15 }
 0x31d   :  { %635 = vmatprep.subr.bf16.mxu0 %v1575_v8  ;;  %1308 = vmatprep.subr.bf16.mxu1 %v1504_v1 }
 0x320   :  { %636 = vmatpush1.bf16.msra.mxu0 %v1586_v10  ;;  %1309 = vmatpush3.bf16.msra.mxu1 %v1636_v18 }
 0x321   :  { %637 = vmatprep.subr.bf16.mxu0 %v1591_v11  ;;  %1310 = vmatprep.subr.bf16.mxu1 %v1504_v1 }
 0x324   :  { %638 = vmatpush1.bf16.msra.mxu0 %v1604_v13  ;;  %1311 = vmatpush3.bf16.msra.mxu1 %v1655_v21 }
 0x325   :  { %639 = vmatprep.subr.bf16.mxu0 %v1610_v14  ;;  %1312 = vmatprep.subr.bf16.mxu1 %v1504_v1 }
 0x328   :  { %640 = vmatpush1.bf16.msra.mxu0 %v1624_v16  ;;  %1313 = vmatpush3.bf16.msra.mxu1 %v1669_v23 }
 0x329   :  { %641 = vmatprep.subr.bf16.mxu0 %v1630_v17  ;;  %1314 = vmatprep.subr.bf16.mxu1 %v1504_v1 }
 0x32c   :  { %642 = vmatpush1.bf16.msra.mxu0 %v1643_v19  ;;  %1315 = vmatpush3.bf16.msra.mxu1 %v1677_v24 }
 0x32d   :  { %643 = vmatprep.subr.bf16.mxu0 %v1649_v20  ;;  %1316 = vmatprep.subr.bf16.mxu1 %v1504_v1 }
 0x330   :  { %644 = vmatpush1.bf16.msra.mxu0 %v1662_v22  ;;  %1317 = vmatpush3.bf16.msra.mxu1 %v1687_v26 }
 0x331   :  { %739 = vmatprep.subr.bf16.mxu0 %v1536_v0  ;;  %1322 = vmatprep.subr.bf16.mxu1 %v1504_v1 }
 0x3d3   :  { %v553_v45 = vpop.f32.mrf.mxu0  ;;  %v594_v46 = vpop.f32.mrf.mxu1 }
 0x3d4   :  { %v604_v47 = vadd.f32 %v1120_v43, %v553_v45  ;;  %v618_v62 = vadd.f32 %v1734_v44, %v594_v46  ;;  %v1127_v43 = vld [vmem:[%s2094_s0 + $0x68] sm:$0xff] }
 0x3d5   :  { %v555_v48 = vpop.f32.mrf.mxu0  ;;  %v1300_v49 = vpop.f32.mrf.mxu1 }
 0x3d6   :  { %v1123_v50 = vmul.f32 -1.442695, %v604_v47  ;;  %v611_v56 = vadd.f32 %v1121_v51, %v555_v48 }
 0x3d7   :  { %v557_v52 = vpop.f32.mrf.mxu0  ;;  %v597_v53 = vpop.f32.mrf.mxu1 }
 0x3d8   :  { %1448 = vpow2.f32 %v1123_v50  ;;  %v1124_v57 = vmul.f32 -1.442695, %v611_v56 }
 0x3d9   :  { %v558_v54 = vpop.f32.mrf.mxu0  ;;  %v1301_v55 = vpop.f32.mrf.mxu1 }
 0x3da   :  { %1450 = vpow2.f32 %v1124_v57  ;;  %v1128_v57 = vld [vmem:[%s2094_s0 + $0x70] sm:$0xff] }
 0x3e5   :  { %v1449_v58 = vpop.eup %1448 }
 0x3e6   :  { %v608_v59 = vadd.f32 1.0, %v1449_v58 }
 0x3e7   :  { %v1451_v60 = vpop.eup %1450 }
 0x3e8   :  { %1452 = vrcp.f32 %v608_v59  ;;  %v615_v61 = vadd.f32 1.0, %v1451_v60 }
 0x3ea   :  { %1454 = vrcp.f32 %v615_v61 }
 0x3f5   :  { %v1453_v63 = vpop.eup %1452 }
 0x3f6   :  { %v619_v27 = vmul.f32 %v1453_v63, %v618_v62 }
 0x3f7   :  { %v1455_v29 = vpop.eup %1454 }
 0x3f8   :  { %v620_v28 = vadd.f32 %v1122_v25, %v619_v27  ;;  %v622_v30 = vsub.f32 1.0, %v1455_v29  ;;  %v624_v33 = vmul.f32 %v1455_v29, %v1848_v41 }
 0x3fa   :  { %1456 = vtanh.f32 %v620_v28 }
 0x407   :  { %v1457_v31 = vpop.eup %1456 }
 0x408   :  { %v623_v32 = vmul.f32 %v1457_v31, %v622_v30  ;;  %v1133_v30 = vld [vmem:[%s2094_s0 + $0x80] sm:$0xff] }
 0x40a   :  { %v1902_v34 = vadd.f32 %v624_v33, %v623_v32 }
 0x40c   :  { %1125 = vst [vmem:[%s2096_s3 + $0x18] sm:$0xff] %v1902_v34  ;;  %v628_v35 = vpack.c.bf16 %v1902_v34, %v1902_v34 }
 0x40e   :  { %662 = vmatmul.mubr.bf16.vlgmr.msra.gmra.mxu0 %v628_v35  ;;  %1319 = vmatmul.mubr.bf16.vlgmr.msra.gmra.mxu1 %v628_v35 }
 0x40f   :  { %740 = vmatpush1.bf16.msra.mxu0 %v1543_v3  ;;  %1323 = vmatpush3.bf16.msra.mxu1 %v1580_v9 }
 0x410   :  { %741 = vmatprep.subr.bf16.mxu0 %v1551_v4  ;;  %1324 = vmatprep.subr.bf16.mxu1 %v1504_v1 }
 0x411   :  { %771 = vmatprep.mubr.bf16.mxu0 %v1505_v2  ;;  %1338 = vmatprep.mubr.msk.bf16.mxu1 %vm1506_vm0, %v1504_v1 }
 0x413   :  { %742 = vmatpush1.bf16.msra.mxu0 %v1557_v5  ;;  %1325 = vmatpush3.bf16.msra.mxu1 %v1598_v12 }
 0x414   :  { %743 = vmatprep.subr.bf16.mxu0 %v1563_v6  ;;  %1326 = vmatprep.subr.bf16.mxu1 %v1504_v1 }
 0x417   :  { %744 = vmatpush1.bf16.msra.mxu0 %v1569_v7  ;;  %1327 = vmatpush3.bf16.msra.mxu1 %v1617_v15 }
 0x418   :  { %745 = vmatprep.subr.bf16.mxu0 %v1575_v8  ;;  %1328 = vmatprep.subr.bf16.mxu1 %v1504_v1 }
 0x41b   :  { %746 = vmatpush1.bf16.msra.mxu0 %v1586_v10  ;;  %1329 = vmatpush3.bf16.msra.mxu1 %v1636_v18 }
 0x41c   :  { %747 = vmatprep.subr.bf16.mxu0 %v1591_v11  ;;  %1330 = vmatprep.subr.bf16.mxu1 %v1504_v1 }
 0x41f   :  { %748 = vmatpush1.bf16.msra.mxu0 %v1604_v13  ;;  %1331 = vmatpush3.bf16.msra.mxu1 %v1655_v21 }
 0x420   :  { %749 = vmatprep.subr.bf16.mxu0 %v1610_v14  ;;  %1332 = vmatprep.subr.bf16.mxu1 %v1504_v1 }
 0x423   :  { %750 = vmatpush1.bf16.msra.mxu0 %v1624_v16  ;;  %1333 = vmatpush3.bf16.msra.mxu1 %v1669_v23 }
 0x424   :  { %751 = vmatprep.subr.bf16.mxu0 %v1630_v17  ;;  %1334 = vmatprep.subr.bf16.mxu1 %v1504_v1 }
 0x427   :  { %752 = vmatpush1.bf16.msra.mxu0 %v1643_v19  ;;  %1335 = vmatpush3.bf16.msra.mxu1 %v1677_v24 }
 0x428   :  { %753 = vmatprep.subr.bf16.mxu0 %v1649_v20  ;;  %1336 = vmatprep.subr.bf16.mxu1 %v1504_v1 }
 0x42b   :  { %754 = vmatpush1.bf16.msra.mxu0 %v1662_v22  ;;  %1337 = vmatpush3.bf16.msra.mxu1 %v1687_v26 }
 0x42c   :  { %849 = vmatprep.subr.bf16.mxu0 %v1536_v0  ;;  %1342 = vmatprep.subr.bf16.mxu1 %v1504_v1 }
 0x4ce   :  { %v663_v37 = vpop.f32.mrf.mxu0  ;;  %v704_v38 = vpop.f32.mrf.mxu1 }
 0x4cf   :  { %v714_v39 = vadd.f32 %v1126_v36, %v663_v37  ;;  %v728_v55 = vadd.f32 %v1734_v44, %v704_v38 }
 0x4d0   :  { %v665_v40 = vpop.f32.mrf.mxu0  ;;  %v1320_v41 = vpop.f32.mrf.mxu1 }
 0x4d1   :  { %v1129_v42 = vmul.f32 -1.442695, %v714_v39  ;;  %v721_v49 = vadd.f32 %v1127_v43, %v665_v40 }
 0x4d2   :  { %v667_v45 = vpop.f32.mrf.mxu0  ;;  %v707_v46 = vpop.f32.mrf.mxu1 }
 0x4d3   :  { %1458 = vpow2.f32 %v1129_v42  ;;  %v1130_v50 = vmul.f32 -1.442695, %v721_v49  ;;  %v1134_v42 = vld [vmem:[%s2094_s0 + $0x88] sm:$0xff] }
 0x4d4   :  { %v668_v47 = vpop.f32.mrf.mxu0  ;;  %v1321_v48 = vpop.f32.mrf.mxu1 }
 0x4d5   :  { %1460 = vpow2.f32 %v1130_v50 }
 0x4e0   :  { %v1459_v51 = vpop.eup %1458 }
 0x4e1   :  { %v718_v52 = vadd.f32 1.0, %v1459_v51 }
 0x4e2   :  { %v1461_v53 = vpop.eup %1460 }
 0x4e3   :  { %1462 = vrcp.f32 %v718_v52  ;;  %v725_v54 = vadd.f32 1.0, %v1461_v53  ;;  %v1498_v53 = vld [vmem:[%s2093_s1 + $0xa8] ss:$12 sps:$4 sm:$0xff]  }
 0x4e5   :  { %1464 = vrcp.f32 %v725_v54  ;;  %v1499_v54 = vld [vmem:[%s2093_s1 + $0x94] ss:$12 sps:$4 sm:$0xff]  }
 0x4f0   :  { %v1463_v56 = vpop.eup %1462 }
 0x4f1   :  { %v729_v58 = vmul.f32 %v1463_v56, %v728_v55  ;;  %v1500_v55 = vld [vmem:[%s2093_s1 + $0x90] ss:$12 sps:$4 sm:$0xff]  }
 0x4f2   :  { %v1465_v60 = vpop.eup %1464  ;;  %v1503_v56 = vld [vmem:[%s2093_s1 + $0x64] ss:$12 sps:$4 sm:$0xff]  }
 0x4f3   :  { %v730_v59 = vadd.f32 %v1128_v57, %v729_v58  ;;  %v732_v61 = vsub.f32 1.0, %v1465_v60  ;;  %v734_v25 = vmul.f32 %v1465_v60, %v1902_v34  ;;  %v1140_v60 = vld [vmem:[%s2094_s0 + $0xa0] sm:$0xff] }
 0x4f5   :  { %1466 = vtanh.f32 %v730_v59 }
 0x502   :  { %v1467_v62 = vpop.eup %1466 }
 0x503   :  { %v733_v63 = vmul.f32 %v1467_v62, %v732_v61 }
 0x505   :  { %v1956_v27 = vadd.f32 %v734_v25, %v733_v63 }
 0x507   :  { %1131 = vst [vmem:[%s2096_s3 + $0x20] sm:$0xff] %v1956_v27  ;;  %v738_v28 = vpack.c.bf16 %v1956_v27, %v1956_v27 }
 0x509   :  { %772 = vmatmul.mubr.bf16.vlgmr.msra.gmra.mxu0 %v738_v28  ;;  %1339 = vmatmul.mubr.bf16.vlgmr.msra.gmra.mxu1 %v738_v28 }
 0x50a   :  { %850 = vmatpush1.bf16.msra.mxu0 %v1543_v3  ;;  %1343 = vmatpush3.bf16.msra.mxu1 %v1580_v9  ;;  %v1132_v3 = vld [vmem:[%s2094_s0 + $0x78] sm:$0xff] }
 0x50b   :  { %851 = vmatprep.subr.bf16.mxu0 %v1551_v4  ;;  %1344 = vmatprep.subr.bf16.mxu1 %v1504_v1 }
 0x50c   :  { %881 = vmatprep.mubr.bf16.mxu0 %v1505_v2  ;;  %1358 = vmatprep.mubr.msk.bf16.mxu1 %vm1506_vm0, %v1504_v1 }
 0x50e   :  { %852 = vmatpush1.bf16.msra.mxu0 %v1557_v5  ;;  %1345 = vmatpush3.bf16.msra.mxu1 %v1598_v12 }
 0x50f   :  { %853 = vmatprep.subr.bf16.mxu0 %v1563_v6  ;;  %1346 = vmatprep.subr.bf16.mxu1 %v1504_v1 }
 0x512   :  { %854 = vmatpush1.bf16.msra.mxu0 %v1569_v7  ;;  %1347 = vmatpush3.bf16.msra.mxu1 %v1617_v15 }
 0x513   :  { %855 = vmatprep.subr.bf16.mxu0 %v1575_v8  ;;  %1348 = vmatprep.subr.bf16.mxu1 %v1504_v1 }
 0x516   :  { %856 = vmatpush1.bf16.msra.mxu0 %v1586_v10  ;;  %1349 = vmatpush3.bf16.msra.mxu1 %v1636_v18 }
 0x517   :  { %857 = vmatprep.subr.bf16.mxu0 %v1591_v11  ;;  %1350 = vmatprep.subr.bf16.mxu1 %v1504_v1 }
 0x51a   :  { %858 = vmatpush1.bf16.msra.mxu0 %v1604_v13  ;;  %1351 = vmatpush3.bf16.msra.mxu1 %v1655_v21 }
 0x51b   :  { %859 = vmatprep.subr.bf16.mxu0 %v1610_v14  ;;  %1352 = vmatprep.subr.bf16.mxu1 %v1504_v1 }
 0x51e   :  { %860 = vmatpush1.bf16.msra.mxu0 %v1624_v16  ;;  %1353 = vmatpush3.bf16.msra.mxu1 %v1669_v23 }
 0x51f   :  { %861 = vmatprep.subr.bf16.mxu0 %v1630_v17  ;;  %1354 = vmatprep.subr.bf16.mxu1 %v1504_v1 }
 0x522   :  { %862 = vmatpush1.bf16.msra.mxu0 %v1643_v19  ;;  %1355 = vmatpush3.bf16.msra.mxu1 %v1677_v24 }
 0x523   :  { %863 = vmatprep.subr.bf16.mxu0 %v1649_v20  ;;  %1356 = vmatprep.subr.bf16.mxu1 %v1504_v1 }
 0x526   :  { %864 = vmatpush1.bf16.msra.mxu0 %v1662_v22  ;;  %1357 = vmatpush3.bf16.msra.mxu1 %v1687_v26 }
 0x527   :  { %959 = vmatprep.subr.bf16.mxu0 %v1536_v0  ;;  %1362 = vmatprep.subr.bf16.mxu1 %v1504_v1 }
 0x5c9   :  { %v773_v4 = vpop.f32.mrf.mxu0  ;;  %v814_v5 = vpop.f32.mrf.mxu1 }
 0x5ca   :  { %v824_v6 = vadd.f32 %v1132_v3, %v773_v4  ;;  %v838_v40 = vadd.f32 %v1734_v44, %v814_v5 }
 0x5cb   :  { %v775_v7 = vpop.f32.mrf.mxu0  ;;  %v1340_v8 = vpop.f32.mrf.mxu1 }
 0x5cc   :  { %v1135_v29 = vmul.f32 -1.442695, %v824_v6  ;;  %v831_v34 = vadd.f32 %v1133_v30, %v775_v7  ;;  %v1144_v6 = vld [vmem:[%s2094_s0 + $0xa8] sm:$0xff] }
 0x5cd   :  { %v777_v31 = vpop.f32.mrf.mxu0  ;;  %v817_v32 = vpop.f32.mrf.mxu1 }
 0x5ce   :  { %1468 = vpow2.f32 %v1135_v29  ;;  %v1136_v35 = vmul.f32 -1.442695, %v831_v34 }
 0x5cf   :  { %v778_v0 = vpop.f32.mrf.mxu0  ;;  %v1341_v33 = vpop.f32.mrf.mxu1 }
 0x5d0   :  { %1470 = vpow2.f32 %v1136_v35  ;;  %v1145_v0 = vld [vmem:[%s2094_s0 + $0xb0] sm:$0xff] }
 0x5db   :  { %v1469_v36 = vpop.eup %1468 }
 0x5dc   :  { %v828_v37 = vadd.f32 1.0, %v1469_v36 }
 0x5dd   :  { %v1471_v38 = vpop.eup %1470 }
 0x5de   :  { %1472 = vrcp.f32 %v828_v37  ;;  %v835_v39 = vadd.f32 1.0, %v1471_v38 }
 0x5e0   :  { %1474 = vrcp.f32 %v835_v39 }
 0x5eb   :  { %v1473_v41 = vpop.eup %1472 }
 0x5ec   :  { %v839_v43 = vmul.f32 %v1473_v41, %v838_v40 }
 0x5ed   :  { %v1475_v46 = vpop.eup %1474 }
 0x5ee   :  { %v840_v45 = vadd.f32 %v1134_v42, %v839_v43  ;;  %v842_v47 = vsub.f32 1.0, %v1475_v46  ;;  %v844_v50 = vmul.f32 %v1475_v46, %v1956_v27  ;;  %v1146_v46 = vld [vmem:[%s2094_s0 + $0xb8] sm:$0xff] }
 0x5f0   :  { %1476 = vtanh.f32 %v840_v45 }
 0x5fd   :  { %v1477_v48 = vpop.eup %1476 }
 0x5fe   :  { %v843_v49 = vmul.f32 %v1477_v48, %v842_v47 }
 0x600   :  { %v2010_v51 = vadd.f32 %v844_v50, %v843_v49 }
 0x602   :  { %1137 = vst [vmem:[%s2096_s3 + $0x28] sm:$0xff] %v2010_v51  ;;  %v848_v52 = vpack.c.bf16 %v2010_v51, %v2010_v51 }
 0x604   :  { %882 = vmatmul.mubr.bf16.vlgmr.msra.gmra.mxu0 %v848_v52  ;;  %1359 = vmatmul.mubr.bf16.vlgmr.msra.gmra.mxu1 %v848_v52 }
 0x605   :  { %960 = vmatpush1.bf16.msra.mxu0 %v1498_v53  ;;  %1363 = vmatpush3.bf16.msra.mxu1 %v1580_v9  ;;  %v1501_v9 = vld [vmem:[%s2093_s1 + $0x7c] ss:$12 sps:$4 sm:$0xff]  }
 0x606   :  { %961 = vmatprep.subr.bf16.mxu0 %v1499_v54  ;;  %1364 = vmatprep.subr.bf16.mxu1 %v1504_v1 }
 0x607   :  { %991 = vmatprep.mubr.bf16.mxu0 %v1505_v2  ;;  %1378 = vmatprep.mubr.msk.bf16.mxu1 %vm1506_vm0, %v1504_v1  ;;  %v1502_v2 = vld [vmem:[%s2093_s1 + $0x78] ss:$12 sps:$4 sm:$0xff]  }
 0x609   :  { %962 = vmatpush1.bf16.msra.mxu0 %v1500_v55  ;;  %1365 = vmatpush3.bf16.msra.mxu1 %v1598_v12 }
 0x60a   :  { %963 = vmatprep.subr.bf16.mxu0 %v1501_v9  ;;  %1366 = vmatprep.subr.bf16.mxu1 %v1504_v1 }
 0x60d   :  { %964 = vmatpush1.bf16.msra.mxu0 %v1502_v2  ;;  %1367 = vmatpush3.bf16.msra.mxu1 %v1617_v15 }
 0x60e   :  { %965 = vmatprep.subr.bf16.mxu0 %v1503_v56  ;;  %1368 = vmatprep.subr.bf16.mxu1 %v1504_v1 }
 0x611   :  { %966 = vmatpush1.bf16.msra.mxu0 %v1586_v10  ;;  %1369 = vmatpush3.bf16.msra.mxu1 %v1636_v18  ;;  %v1138_v10 = vld [vmem:[%s2094_s0 + $0x90] sm:$0xff] }
 0x612   :  { %967 = vmatprep.subr.bf16.mxu0 %v1591_v11  ;;  %1370 = vmatprep.subr.bf16.mxu1 %v1504_v1 }
 0x615   :  { %968 = vmatpush1.bf16.msra.mxu0 %v1604_v13  ;;  %1371 = vmatpush3.bf16.msra.mxu1 %v1655_v21 }
 0x616   :  { %969 = vmatprep.subr.bf16.mxu0 %v1610_v14  ;;  %1372 = vmatprep.subr.bf16.mxu1 %v1504_v1 }
 0x619   :  { %970 = vmatpush1.bf16.msra.mxu0 %v1624_v16  ;;  %1373 = vmatpush3.bf16.msra.mxu1 %v1669_v23 }
 0x61a   :  { %971 = vmatprep.subr.bf16.mxu0 %v1630_v17  ;;  %1374 = vmatprep.subr.bf16.mxu1 %v1504_v1  ;;  %v1139_v17 = vld [vmem:[%s2094_s0 + $0x98] sm:$0xff] }
 0x61d   :  { %972 = vmatpush1.bf16.msra.mxu0 %v1643_v19  ;;  %1375 = vmatpush3.bf16.msra.mxu1 %v1677_v24 }
 0x61e   :  { %973 = vmatprep.subr.bf16.mxu0 %v1649_v20  ;;  %1376 = vmatprep.subr.bf16.mxu1 %v1504_v1 }
 0x621   :  { %974 = vmatpush1.bf16.msra.mxu0 %v1662_v22  ;;  %1377 = vmatpush3.bf16.msra.mxu1 %v1687_v26 }
 0x6c4   :  { %v883_v11 = vpop.f32.mrf.mxu0  ;;  %v924_v12 = vpop.f32.mrf.mxu1 }
 0x6c5   :  { %v934_v13 = vadd.f32 %v1138_v10, %v883_v11  ;;  %v948_v58 = vadd.f32 %v1734_v44, %v924_v12 }
 0x6c6   :  { %v885_v14 = vpop.f32.mrf.mxu0  ;;  %v1360_v15 = vpop.f32.mrf.mxu1 }
 0x6c7   :  { %v1141_v16 = vmul.f32 -1.442695, %v934_v13  ;;  %v941_v21 = vadd.f32 %v1139_v17, %v885_v14 }
 0x6c8   :  { %v887_v18 = vpop.f32.mrf.mxu0  ;;  %v927_v1 = vpop.f32.mrf.mxu1 }
 0x6c9   :  { %1478 = vpow2.f32 %v1141_v16  ;;  %v1142_v22 = vmul.f32 -1.442695, %v941_v21 }
 0x6ca   :  { %v888_v19 = vpop.f32.mrf.mxu0  ;;  %v1361_v20 = vpop.f32.mrf.mxu1 }
 0x6cb   :  { %1480 = vpow2.f32 %v1142_v22 }
 0x6d6   :  { %v1479_v23 = vpop.eup %1478 }
 0x6d7   :  { %v938_v24 = vadd.f32 1.0, %v1479_v23 }
 0x6d8   :  { %v1481_v26 = vpop.eup %1480 }
 0x6d9   :  { %1482 = vrcp.f32 %v938_v24  ;;  %v945_v57 = vadd.f32 1.0, %v1481_v26 }
 0x6db   :  { %1484 = vrcp.f32 %v945_v57 }
 0x6e6   :  { %v1483_v59 = vpop.eup %1482 }
 0x6e7   :  { %v949_v61 = vmul.f32 %v1483_v59, %v948_v58 }
 0x6e8   :  { %v1485_v63 = vpop.eup %1484 }
 0x6e9   :  { %v950_v62 = vadd.f32 %v1140_v60, %v949_v61  ;;  %v952_v25 = vsub.f32 1.0, %v1485_v63  ;;  %v954_v3 = vmul.f32 %v1485_v63, %v2010_v51 }
 0x6eb   :  { %1486 = vtanh.f32 %v950_v62 }
 0x6f8   :  { %v1487_v27 = vpop.eup %1486 }
 0x6f9   :  { %v953_v28 = vmul.f32 %v1487_v27, %v952_v25 }
 0x6fb   :  { %v955_v4 = vadd.f32 %v954_v3, %v953_v28 }
 0x6fd   :  { %1143 = vst [vmem:[%s2096_s3 + $0x30] sm:$0xff] %v955_v4  ;;  %v958_v5 = vpack.c.bf16 %v955_v4, %v955_v4 }
 0x6ff   :  { %992 = vmatmul.mubr.bf16.vlgmr.msra.gmra.mxu0 %v958_v5  ;;  %1379 = vmatmul.mubr.bf16.vlgmr.msra.gmra.mxu1 %v958_v5 }
 0x7bf   :  { %v993_v7 = vpop.f32.mrf.mxu0  ;;  %v1034_v8 = vpop.f32.mrf.mxu1 }
 0x7c0   :  { %v1044_v29 = vadd.f32 %v1144_v6, %v993_v7  ;;  %v1058_v43 = vadd.f32 %v1734_v44, %v1034_v8 }
 0x7c1   :  { %v995_v30 = vpop.f32.mrf.mxu0  ;;  %v1380_v31 = vpop.f32.mrf.mxu1 }
 0x7c2   :  { %v1147_v32 = vmul.f32 -1.442695, %v1044_v29  ;;  %v1051_v37 = vadd.f32 %v1145_v0, %v995_v30 }
 0x7c3   :  { %v997_v33 = vpop.f32.mrf.mxu0  ;;  %v1037_v34 = vpop.f32.mrf.mxu1 }
 0x7c4   :  { %1488 = vpow2.f32 %v1147_v32  ;;  %v1148_v38 = vmul.f32 -1.442695, %v1051_v37 }
 0x7c5   :  { %v998_v35 = vpop.f32.mrf.mxu0  ;;  %v1381_v36 = vpop.f32.mrf.mxu1 }
 0x7c6   :  { %1490 = vpow2.f32 %v1148_v38 }
 0x7d1   :  { %v1489_v39 = vpop.eup %1488 }
 0x7d2   :  { %v1048_v40 = vadd.f32 1.0, %v1489_v39 }
 0x7d3   :  { %v1491_v41 = vpop.eup %1490 }
 0x7d4   :  { %1492 = vrcp.f32 %v1048_v40  ;;  %v1055_v42 = vadd.f32 1.0, %v1491_v41 }
 0x7d6   :  { %1494 = vrcp.f32 %v1055_v42 }
 0x7e1   :  { %v1493_v45 = vpop.eup %1492 }
 0x7e2   :  { %v1059_v47 = vmul.f32 %v1493_v45, %v1058_v43 }
 0x7e3   :  { %v1495_v49 = vpop.eup %1494 }
 0x7e4   :  { %v1060_v48 = vadd.f32 %v1146_v46, %v1059_v47  ;;  %v1062_v50 = vsub.f32 1.0, %v1495_v49  ;;  %v1064_v53 = vmul.f32 %v1495_v49, %v955_v4 }
 0x7e6   :  { %1496 = vtanh.f32 %v1060_v48 }
 0x7f3   :  { %v1497_v51 = vpop.eup %1496 }
 0x7f4   :  { %v1063_v52 = vmul.f32 %v1497_v51, %v1062_v50 }
 0x7f6   :  { %v1065_v54 = vadd.f32 %v1064_v53, %v1063_v52 }
 0x7f8   :  { %1149 = vst [vmem:[%s2096_s3 + $0x38] sm:$0xff] %v1065_v54  ;;  %1072 = vst [vmem:[%s2097_s4] sm:$0xff] %v1065_v54 }

</bundles_post_ra>
